<compile_context>
chip_gen: v7x
topology: tpu7x:2x2x1
jax: 0.10.0
libtpu: 0.0.40
codegen_flags: <defaults>
</compile_context>

<pallas_src>
import math
import jax
import jax.numpy as jnp
from jax.experimental import pallas as pl
from jax.experimental.pallas import tpu as pltpu

# ---- configuration: mirrors ST_ATT_Layer(input_size=128, output_size=32,
#      h_num=2, h_dim=16, dp_rate=0.0, time_len=8, joint_num=8) ----
B = 2            # batch
T = 8            # time_len (MultiHeadedAttention hardcodes time_len = 8)
J = 8            # joint_num (!= 22  -> "abs(scores)==0" masking branch)
FT = 128         # input feature size (hardcoded 128 in ST_ATT_Layer.forward)
H_NUM = 2        # heads
H_DIM = 16       # head dim
MODEL = H_NUM * H_DIM
OUT = 32         # output_size
W = T - 2        # number of 3-frame sliding windows
TJ = 3 * J       # tokens per window (3 frames x joint_num)
EPS = 1e-6       # custom LayerNorm eps (added to std, not var)


def st_att_kernel(x_ref, spe_ref, tpe_ref, amask_ref,
                  wqkv_ref, bqkv_ref, wcls_ref, bcls_ref,
                  wft_ref, bft_ref, a2_ref, b2_ref, o_ref):
    # ---- PositionalEncoding on this batch element's (T, J, FT) slab ----
    x = x_ref[0]                                                   # (T, J, FT)
    x = x + spe_ref[...][None, :, :] + tpe_ref[...][:, None, :]

    # ---- build all W overlapping 3-frame windows in VMEM (window-major) ----
    xw = jnp.concatenate([x[w:w + 3].reshape(TJ, FT) for w in range(W)], axis=0)
    # xw: (W*TJ, FT) = (144, 128)

    # ---- fused Q/K/V projection: single MXU matmul; 1/sqrt(h_dim) folded in ----
    qkv = jnp.dot(xw, wqkv_ref[...],
                  preferred_element_type=jnp.float32) + bqkv_ref[...]   # (144, 96)
    q = qkv[:, 0 * MODEL:1 * MODEL].reshape(W, TJ, MODEL)
    k = qkv[:, 1 * MODEL:2 * MODEL].reshape(W, TJ, MODEL)
    v = jnp.maximum(qkv[:, 2 * MODEL:3 * MODEL], 0.0).reshape(W, TJ, MODEL)  # ReLU in value_map

    amask = amask_ref[...][None, :, :]          # additive mask: 0 / -9e15, (1, TJ, TJ)

    # ---- masked scaled-dot-product attention, batched over all W windows ----
    ctx_heads = []
    for h in range(H_NUM):                      # static unroll over heads
        sl = slice(h * H_DIM, (h + 1) * H_DIM)
        qh, kh, vh = q[:, :, sl], k[:, :, sl], v[:, :, sl]          # (W, TJ, D)
        s = jnp.einsum('bqd,bkd->bqk', qh, kh,
                       preferred_element_type=jnp.float32) + amask   # (W, TJ, TJ)
        s = s - jnp.max(s, axis=-1, keepdims=True)                   # stable softmax
        p = jnp.exp(s)
        p = p * pl.reciprocal(jnp.sum(p, axis=-1, keepdims=True), approx=True)
        ctx_heads.append(jnp.einsum('bqk,bkd->bqd', p, vh,
                                    preferred_element_type=jnp.float32))
    ctx = jnp.concatenate(ctx_heads, axis=-1)                        # (W, TJ, MODEL)

    # ---- cls: Linear(3J -> J) along the token axis, both heads at once ----
    wcls = jnp.broadcast_to(wcls_ref[...], (W, J, TJ))
    y = jnp.einsum('bjt,btm->bjm', wcls, ctx,
                   preferred_element_type=jnp.float32)
    y = y + bcls_ref[...][None, :, :]                                # (W, J, MODEL)

    # ---- ft_map: Linear -> ReLU -> LayerNorm (dropout = identity) ----
    z = jnp.dot(y.reshape(W * J, MODEL), wft_ref[...],
                preferred_element_type=jnp.float32) + bft_ref[...]   # (W*J, OUT)
    z = jnp.maximum(z, 0.0)
    mean = jnp.mean(z, axis=-1, keepdims=True)
    # torch.std defaults to unbiased (divide by N-1); eps added to std
    var = jnp.sum((z - mean) ** 2, axis=-1, keepdims=True) * (1.0 / (OUT - 1))
    inv = pl.reciprocal(jnp.sqrt(var) + EPS, approx=True)
    o_ref[0] = a2_ref[...] * (z - mean) * inv + b2_ref[...]          # (W*J, OUT)


def st_att_layer(x, params):
    b, t, j, ft = x.shape
    assert (t, j, ft) == (T, J, FT)

    def const(shape):
        return pl.BlockSpec(shape, lambda i: (0,) * len(shape))

    out = pl.pallas_call(
        st_att_kernel,
        out_shape=jax.ShapeDtypeStruct((b, W * J, OUT), jnp.float32),
        grid=(b,),
        in_specs=[
            pl.BlockSpec((1, T, J, FT), lambda i: (i, 0, 0, 0)),   # x (one batch element)
            const((J, FT)),                                        # Spe
            const((T, FT)),                                        # Tpe
            const((TJ, TJ)),                                       # additive mask
            const((FT, 3 * MODEL)), const((1, 3 * MODEL)),         # Wqkv, bqkv (fused)
            const((J, TJ)), const((J, 1)),                         # Wcls, bcls
            const((MODEL, OUT)), const((1, OUT)),                  # Wft, bft
            const((1, OUT)), const((1, OUT)),                      # a_2, b_2
        ],
        out_specs=pl.BlockSpec((1, W * J, OUT), lambda i: (i, 0, 0)),
        compiler_params=pltpu.CompilerParams(dimension_semantics=("parallel",)),
    )(x, params["Spe"], params["Tpe"], params["amask"],
      params["wqkv"], params["bqkv"], params["wcls"], params["bcls"],
      params["wft"], params["bft"], params["a2"], params["b2"])
    return out


def init_params(key):
    def xavier(k, out_dim, in_dim):
        bound = math.sqrt(6.0 / (in_dim + out_dim))
        return jax.random.uniform(k, (out_dim, in_dim), jnp.float32, -bound, bound)

    def lin_bias(k, fan_in, dim):
        bound = 1.0 / math.sqrt(fan_in)
        return jax.random.uniform(k, (dim,), jnp.float32, -bound, bound)

    ks = jax.random.split(key, 10)
    inv_sqrt_d = 1.0 / math.sqrt(H_DIM)

    # Linear weights stored pre-transposed as (in, out) for x @ W.
    # 1/sqrt(h_dim) score scale is folded into the q weights & bias.
    wq = xavier(ks[0], MODEL, FT).T * inv_sqrt_d
    bq = lin_bias(ks[1], FT, MODEL) * inv_sqrt_d
    wk = xavier(ks[2], MODEL, FT).T
    bk = lin_bias(ks[3], FT, MODEL)
    wv = xavier(ks[4], MODEL, FT).T
    bv = lin_bias(ks[5], FT, MODEL)

    p = {}
    p["wqkv"] = jnp.concatenate([wq, wk, wv], axis=1)               # (FT, 96)
    p["bqkv"] = jnp.concatenate([bq, bk, bv]).reshape(1, 3 * MODEL) # (1, 96)
    p["wcls"] = xavier(ks[6], J, TJ)                                # (J, 3J)
    p["bcls"] = lin_bias(ks[7], TJ, J).reshape(J, 1)
    p["wft"] = xavier(ks[8], OUT, MODEL).T                          # (MODEL, OUT)
    p["bft"] = lin_bias(ks[9], MODEL, OUT).reshape(1, OUT)
    p["a2"] = jnp.ones((1, OUT), jnp.float32)                       # LayerNorm gain
    p["b2"] = jnp.zeros((1, OUT), jnp.float32)                      # LayerNorm bias

    # domain mask: frame-0 joints and frame-2 joints cannot attend to each other.
    # Stored in ADDITIVE form (0 = allowed, -9e15 = blocked). The reference
    # multiplies by a 0/1 mask and then sets abs(score)==0 to -9e15; equivalent
    # except for scores that are exactly 0.0 (measure-zero with float inputs).
    mask = jnp.ones((TJ, TJ), jnp.float32)
    mask = mask.at[0:J, 2 * J:3 * J].set(0.0)
    mask = mask.at[2 * J:3 * J, 0:J].set(0.0)
    p["amask"] = (1.0 - mask) * (-9e15)

    # positional encodings (buffers)
    pos_s = jnp.arange(J, dtype=jnp.float32)[:, None]
    pos_t = jnp.arange(T, dtype=jnp.float32)[:, None]
    div = jnp.exp(jnp.arange(0, FT, 2, dtype=jnp.float32) * (-math.log(10000.0) / FT))
    spe = jnp.zeros((J, FT), jnp.float32)
    spe = spe.at[:, 0::2].set(jnp.sin(pos_s * div))
    spe = spe.at[:, 1::2].set(jnp.cos(pos_s * div))
    tpe = jnp.zeros((T, FT), jnp.float32)
    tpe = tpe.at[:, 0::2].set(jnp.sin(pos_t * div))
    tpe = tpe.at[:, 1::2].set(jnp.cos(pos_t * div))
    p["Spe"] = spe
    p["Tpe"] = tpe
    return p


if __name__ == "__main__":
    key = jax.random.PRNGKey(0)
    kx, kp = jax.random.split(key)
    x = jax.random.normal(kx, (B, T, J, FT), jnp.float32)
    params = init_params(kp)

    out = jax.jit(st_att_layer)(x, params)
    out = jax.block_until_ready(out)

    assert out.shape == (B, W * J, OUT), out.shape
    assert bool(jnp.all(jnp.isfinite(out)))
    print("KERNEL_OK")
</pallas_src>

<mosaic_0001>
module attributes {stable_mosaic.version = 11 : i64} {
  func.func @st_att_kernel(%arg0: i32, %arg1: memref<1x8x8x128xf32, #tpu.memory_space<vmem>>, %arg2: memref<8x128xf32, #tpu.memory_space<vmem>>, %arg3: memref<8x128xf32, #tpu.memory_space<vmem>>, %arg4: memref<24x24xf32, #tpu.memory_space<vmem>>, %arg5: memref<128x96xf32, #tpu.memory_space<vmem>>, %arg6: memref<1x96xf32, #tpu.memory_space<vmem>>, %arg7: memref<8x24xf32, #tpu.memory_space<vmem>>, %arg8: memref<8x1xf32, #tpu.memory_space<vmem>>, %arg9: memref<32x32xf32, #tpu.memory_space<vmem>>, %arg10: memref<1x32xf32, #tpu.memory_space<vmem>>, %arg11: memref<1x32xf32, #tpu.memory_space<vmem>>, %arg12: memref<1x32xf32, #tpu.memory_space<vmem>>, %arg13: memref<1x48x32xf32, #tpu.memory_space<vmem>>) attributes {dimension_semantics = [#tpu.dimension_semantics<parallel>], iteration_bounds = array<i64: 2>, scalar_prefetch = 0 : i64, scratch_operands = 0 : i64, tpu.core_type = #tpu.core_type<tc>, window_params = [{transform_indices = @transform_0, window_bounds = array<i64: 1, 8, 8, 128>}, {pipeline_mode = #tpu.pipeline_mode<synchronous>, transform_indices = @transform_1, window_bounds = array<i64: 8, 128>}, {pipeline_mode = #tpu.pipeline_mode<synchronous>, transform_indices = @transform_2, window_bounds = array<i64: 8, 128>}, {pipeline_mode = #tpu.pipeline_mode<synchronous>, transform_indices = @transform_3, window_bounds = array<i64: 24, 24>}, {pipeline_mode = #tpu.pipeline_mode<synchronous>, transform_indices = @transform_4, window_bounds = array<i64: 128, 96>}, {pipeline_mode = #tpu.pipeline_mode<synchronous>, transform_indices = @transform_5, window_bounds = array<i64: 1, 96>}, {pipeline_mode = #tpu.pipeline_mode<synchronous>, transform_indices = @transform_6, window_bounds = array<i64: 8, 24>}, {pipeline_mode = #tpu.pipeline_mode<synchronous>, transform_indices = @transform_7, window_bounds = array<i64: 8, 1>}, {pipeline_mode = #tpu.pipeline_mode<synchronous>, transform_indices = @transform_8, window_bounds = array<i64: 32, 32>}, {pipeline_mode = #tpu.pipeline_mode<synchronous>, transform_indices = @transform_9, window_bounds = array<i64: 1, 32>}, {pipeline_mode = #tpu.pipeline_mode<synchronous>, transform_indices = @transform_10, window_bounds = array<i64: 1, 32>}, {pipeline_mode = #tpu.pipeline_mode<synchronous>, transform_indices = @transform_11, window_bounds = array<i64: 1, 32>}, {transform_indices = @transform_12, window_bounds = array<i64: 1, 48, 32>}]} {
    %c0 = arith.constant 0 : index
    %c0_0 = arith.constant 0 : index
    %c0_1 = arith.constant 0 : index
    %c0_2 = arith.constant 0 : index
    %0 = vector.load %arg1[%c0, %c0_0, %c0_1, %c0_2] : memref<1x8x8x128xf32, #tpu.memory_space<vmem>>, vector<1x8x8x128xf32>
    %1 = vector.shape_cast %0 : vector<1x8x8x128xf32> to vector<8x8x128xf32>
    %c0_3 = arith.constant 0 : index
    %c0_4 = arith.constant 0 : index
    %2 = vector.load %arg2[%c0_3, %c0_4] : memref<8x128xf32, #tpu.memory_space<vmem>>, vector<8x128xf32>
    %3 = vector.shape_cast %2 : vector<8x128xf32> to vector<1x8x128xf32>
    %4 = vector.broadcast %3 : vector<1x8x128xf32> to vector<8x8x128xf32>
    %5 = arith.addf %1, %4 : vector<8x8x128xf32>
    %c0_5 = arith.constant 0 : index
    %c0_6 = arith.constant 0 : index
    %6 = vector.load %arg3[%c0_5, %c0_6] : memref<8x128xf32, #tpu.memory_space<vmem>>, vector<8x128xf32>
    %7 = vector.shape_cast %6 : vector<8x128xf32> to vector<8x1x128xf32>
    %8 = vector.broadcast %7 : vector<8x1x128xf32> to vector<8x8x128xf32>
    %9 = arith.addf %5, %8 : vector<8x8x128xf32>
    %10 = vector.extract_strided_slice %9 {offsets = [0, 0, 0], sizes = [3, 8, 128], strides = [1, 1, 1]} : vector<8x8x128xf32> to vector<3x8x128xf32>
    %11 = vector.shape_cast %10 : vector<3x8x128xf32> to vector<24x128xf32>
    %12 = vector.extract_strided_slice %9 {offsets = [1, 0, 0], sizes = [3, 8, 128], strides = [1, 1, 1]} : vector<8x8x128xf32> to vector<3x8x128xf32>
    %13 = vector.shape_cast %12 : vector<3x8x128xf32> to vector<24x128xf32>
    %14 = vector.extract_strided_slice %9 {offsets = [2, 0, 0], sizes = [3, 8, 128], strides = [1, 1, 1]} : vector<8x8x128xf32> to vector<3x8x128xf32>
    %15 = vector.shape_cast %14 : vector<3x8x128xf32> to vector<24x128xf32>
    %16 = vector.extract_strided_slice %9 {offsets = [3, 0, 0], sizes = [3, 8, 128], strides = [1, 1, 1]} : vector<8x8x128xf32> to vector<3x8x128xf32>
    %17 = vector.shape_cast %16 : vector<3x8x128xf32> to vector<24x128xf32>
    %18 = vector.extract_strided_slice %9 {offsets = [4, 0, 0], sizes = [3, 8, 128], strides = [1, 1, 1]} : vector<8x8x128xf32> to vector<3x8x128xf32>
    %19 = vector.shape_cast %18 : vector<3x8x128xf32> to vector<24x128xf32>
    %20 = vector.extract_strided_slice %9 {offsets = [5, 0, 0], sizes = [3, 8, 128], strides = [1, 1, 1]} : vector<8x8x128xf32> to vector<3x8x128xf32>
    %21 = vector.shape_cast %20 : vector<3x8x128xf32> to vector<24x128xf32>
    %22 = tpu.concatenate %11, %13, %15, %17, %19, %21 in 0 : vector<24x128xf32>, vector<24x128xf32>, vector<24x128xf32>, vector<24x128xf32>, vector<24x128xf32>, vector<24x128xf32> -> vector<144x128xf32>
    %c0_7 = arith.constant 0 : index
    %c0_8 = arith.constant 0 : index
    %23 = vector.load %arg5[%c0_7, %c0_8] : memref<128x96xf32, #tpu.memory_space<vmem>>, vector<128x96xf32>
    %cst = arith.constant dense<0.000000e+00> : vector<144x96xf32>
    %24 = tpu.matmul %22, %23, %cst {dimension_numbers = #tpu.dot_dimension_numbers<[1], [0], [0], [1], [0, 0, 1, 1], [], []>} : vector<144x128xf32>, vector<128x96xf32>, vector<144x96xf32> -> vector<144x96xf32>
    %c0_9 = arith.constant 0 : index
    %c0_10 = arith.constant 0 : index
    %25 = vector.load %arg6[%c0_9, %c0_10] : memref<1x96xf32, #tpu.memory_space<vmem>>, vector<1x96xf32>
    %26 = vector.broadcast %25 : vector<1x96xf32> to vector<144x96xf32>
    %27 = arith.addf %24, %26 : vector<144x96xf32>
    %28 = vector.extract_strided_slice %27 {offsets = [0, 0], sizes = [144, 32], strides = [1, 1]} : vector<144x96xf32> to vector<144x32xf32>
    %29 = vector.shape_cast %28 : vector<144x32xf32> to vector<6x24x32xf32>
    %30 = vector.extract_strided_slice %27 {offsets = [0, 32], sizes = [144, 32], strides = [1, 1]} : vector<144x96xf32> to vector<144x32xf32>
    %31 = vector.shape_cast %30 : vector<144x32xf32> to vector<6x24x32xf32>
    %32 = vector.extract_strided_slice %27 {offsets = [0, 64], sizes = [144, 32], strides = [1, 1]} : vector<144x96xf32> to vector<144x32xf32>
    %cst_11 = arith.constant 0.000000e+00 : f32
    %33 = vector.broadcast %cst_11 : f32 to vector<144x32xf32>
    %34 = arith.maximumf %32, %33 : vector<144x32xf32>
    %35 = vector.shape_cast %34 : vector<144x32xf32> to vector<6x24x32xf32>
    %c0_12 = arith.constant 0 : index
    %c0_13 = arith.constant 0 : index
    %36 = vector.load %arg4[%c0_12, %c0_13] : memref<24x24xf32, #tpu.memory_space<vmem>>, vector<24x24xf32>
    %37 = vector.shape_cast %36 : vector<24x24xf32> to vector<1x24x24xf32>
    %38 = vector.extract_strided_slice %29 {offsets = [0, 0, 0], sizes = [6, 24, 16], strides = [1, 1, 1]} : vector<6x24x32xf32> to vector<6x24x16xf32>
    %39 = vector.extract_strided_slice %31 {offsets = [0, 0, 0], sizes = [6, 24, 16], strides = [1, 1, 1]} : vector<6x24x32xf32> to vector<6x24x16xf32>
    %40 = vector.extract_strided_slice %35 {offsets = [0, 0, 0], sizes = [6, 24, 16], strides = [1, 1, 1]} : vector<6x24x32xf32> to vector<6x24x16xf32>
    "tpu.trace_start"() <{level = 10 : i32, message = "bqd,bkd->bqk"}> : () -> ()
    %cst_14 = arith.constant dense<0.000000e+00> : vector<6x24x24xf32>
    %41 = tpu.matmul %38, %39, %cst_14 {dimension_numbers = #tpu.dot_dimension_numbers<[2], [2], [1], [1], [0, 0, 0, 1, 1, 1], [0], [0]>} : vector<6x24x16xf32>, vector<6x24x16xf32>, vector<6x24x24xf32> -> vector<6x24x24xf32>
    "tpu.trace_stop"() : () -> ()
    %42 = vector.broadcast %37 : vector<1x24x24xf32> to vector<6x24x24xf32>
    %43 = arith.addf %41, %42 : vector<6x24x24xf32>
    %cst_15 = arith.constant dense<0xFF800000> : vector<6x24xf32>
    %44 = vector.multi_reduction <maximumf>, %43, %cst_15 [2] : vector<6x24x24xf32> to vector<6x24xf32>
    %45 = vector.shape_cast %44 : vector<6x24xf32> to vector<6x24x1xf32>
    %46 = vector.broadcast %45 : vector<6x24x1xf32> to vector<6x24x24xf32>
    %47 = arith.subf %43, %46 : vector<6x24x24xf32>
    %48 = math.exp %47 : vector<6x24x24xf32>
    %cst_16 = arith.constant dense<0.000000e+00> : vector<6x24xf32>
    %49 = vector.multi_reduction <add>, %48, %cst_16 [2] : vector<6x24x24xf32> to vector<6x24xf32>
    %50 = vector.shape_cast %49 : vector<6x24xf32> to vector<6x24x1xf32>
    %51 = tpu.reciprocal %50 {approx = true} : vector<6x24x1xf32> -> vector<6x24x1xf32>
    %52 = vector.broadcast %51 : vector<6x24x1xf32> to vector<6x24x24xf32>
    %53 = arith.mulf %48, %52 : vector<6x24x24xf32>
    "tpu.trace_start"() <{level = 10 : i32, message = "bqk,bkd->bqd"}> : () -> ()
    %cst_17 = arith.constant dense<0.000000e+00> : vector<6x24x16xf32>
    %54 = tpu.matmul %53, %40, %cst_17 {dimension_numbers = #tpu.dot_dimension_numbers<[2], [1], [1], [2], [0, 0, 0, 1, 1, 2], [0], [0]>} : vector<6x24x24xf32>, vector<6x24x16xf32>, vector<6x24x16xf32> -> vector<6x24x16xf32>
    "tpu.trace_stop"() : () -> ()
    %55 = vector.extract_strided_slice %29 {offsets = [0, 0, 16], sizes = [6, 24, 16], strides = [1, 1, 1]} : vector<6x24x32xf32> to vector<6x24x16xf32>
    %56 = vector.extract_strided_slice %31 {offsets = [0, 0, 16], sizes = [6, 24, 16], strides = [1, 1, 1]} : vector<6x24x32xf32> to vector<6x24x16xf32>
    %57 = vector.extract_strided_slice %35 {offsets = [0, 0, 16], sizes = [6, 24, 16], strides = [1, 1, 1]} : vector<6x24x32xf32> to vector<6x24x16xf32>
    "tpu.trace_start"() <{level = 10 : i32, message = "bqd,bkd->bqk"}> : () -> ()
    %cst_18 = arith.constant dense<0.000000e+00> : vector<6x24x24xf32>
    %58 = tpu.matmul %55, %56, %cst_18 {dimension_numbers = #tpu.dot_dimension_numbers<[2], [2], [1], [1], [0, 0, 0, 1, 1, 1], [0], [0]>} : vector<6x24x16xf32>, vector<6x24x16xf32>, vector<6x24x24xf32> -> vector<6x24x24xf32>
    "tpu.trace_stop"() : () -> ()
    %59 = vector.broadcast %37 : vector<1x24x24xf32> to vector<6x24x24xf32>
    %60 = arith.addf %58, %59 : vector<6x24x24xf32>
    %cst_19 = arith.constant dense<0xFF800000> : vector<6x24xf32>
    %61 = vector.multi_reduction <maximumf>, %60, %cst_19 [2] : vector<6x24x24xf32> to vector<6x24xf32>
    %62 = vector.shape_cast %61 : vector<6x24xf32> to vector<6x24x1xf32>
    %63 = vector.broadcast %62 : vector<6x24x1xf32> to vector<6x24x24xf32>
    %64 = arith.subf %60, %63 : vector<6x24x24xf32>
    %65 = math.exp %64 : vector<6x24x24xf32>
    %cst_20 = arith.constant dense<0.000000e+00> : vector<6x24xf32>
    %66 = vector.multi_reduction <add>, %65, %cst_20 [2] : vector<6x24x24xf32> to vector<6x24xf32>
    %67 = vector.shape_cast %66 : vector<6x24xf32> to vector<6x24x1xf32>
    %68 = tpu.reciprocal %67 {approx = true} : vector<6x24x1xf32> -> vector<6x24x1xf32>
    %69 = vector.broadcast %68 : vector<6x24x1xf32> to vector<6x24x24xf32>
    %70 = arith.mulf %65, %69 : vector<6x24x24xf32>
    "tpu.trace_start"() <{level = 10 : i32, message = "bqk,bkd->bqd"}> : () -> ()
    %cst_21 = arith.constant dense<0.000000e+00> : vector<6x24x16xf32>
    %71 = tpu.matmul %70, %57, %cst_21 {dimension_numbers = #tpu.dot_dimension_numbers<[2], [1], [1], [2], [0, 0, 0, 1, 1, 2], [0], [0]>} : vector<6x24x24xf32>, vector<6x24x16xf32>, vector<6x24x16xf32> -> vector<6x24x16xf32>
    "tpu.trace_stop"() : () -> ()
    %72 = tpu.concatenate %54, %71 in 2 : vector<6x24x16xf32>, vector<6x24x16xf32> -> vector<6x24x32xf32>
    %c0_22 = arith.constant 0 : index
    %c0_23 = arith.constant 0 : index
    %73 = vector.load %arg7[%c0_22, %c0_23] : memref<8x24xf32, #tpu.memory_space<vmem>>, vector<8x24xf32>
    %74 = vector.shape_cast %73 : vector<8x24xf32> to vector<1x8x24xf32>
    %75 = vector.broadcast %74 : vector<1x8x24xf32> to vector<6x8x24xf32>
    "tpu.trace_start"() <{level = 10 : i32, message = "bjt,btm->bjm"}> : () -> ()
    %cst_24 = arith.constant dense<0.000000e+00> : vector<6x8x32xf32>
    %76 = tpu.matmul %75, %72, %cst_24 {dimension_numbers = #tpu.dot_dimension_numbers<[2], [1], [1], [2], [0, 0, 0, 1, 1, 2], [0], [0]>} : vector<6x8x24xf32>, vector<6x24x32xf32>, vector<6x8x32xf32> -> vector<6x8x32xf32>
    "tpu.trace_stop"() : () -> ()
    %c0_25 = arith.constant 0 : index
    %c0_26 = arith.constant 0 : index
    %77 = vector.load %arg8[%c0_25, %c0_26] : memref<8x1xf32, #tpu.memory_space<vmem>>, vector<8x1xf32>
    %78 = vector.shape_cast %77 : vector<8x1xf32> to vector<1x8x1xf32>
    %79 = vector.broadcast %78 : vector<1x8x1xf32> to vector<6x8x32xf32>
    %80 = arith.addf %76, %79 : vector<6x8x32xf32>
    %81 = vector.shape_cast %80 : vector<6x8x32xf32> to vector<48x32xf32>
    %c0_27 = arith.constant 0 : index
    %c0_28 = arith.constant 0 : index
    %82 = vector.load %arg9[%c0_27, %c0_28] : memref<32x32xf32, #tpu.memory_space<vmem>>, vector<32x32xf32>
    %cst_29 = arith.constant dense<0.000000e+00> : vector<48x32xf32>
    %83 = tpu.matmul %81, %82, %cst_29 {dimension_numbers = #tpu.dot_dimension_numbers<[1], [0], [0], [1], [0, 0, 1, 1], [], []>} : vector<48x32xf32>, vector<32x32xf32>, vector<48x32xf32> -> vector<48x32xf32>
    %c0_30 = arith.constant 0 : index
    %c0_31 = arith.constant 0 : index
    %84 = vector.load %arg10[%c0_30, %c0_31] : memref<1x32xf32, #tpu.memory_space<vmem>>, vector<1x32xf32>
    %85 = vector.broadcast %84 : vector<1x32xf32> to vector<48x32xf32>
    %86 = arith.addf %83, %85 : vector<48x32xf32>
    %cst_32 = arith.constant 0.000000e+00 : f32
    %87 = vector.broadcast %cst_32 : f32 to vector<48x32xf32>
    %88 = arith.maximumf %86, %87 : vector<48x32xf32>
    %cst_33 = arith.constant dense<0.000000e+00> : vector<48xf32>
    %89 = vector.multi_reduction <add>, %88, %cst_33 [1] : vector<48x32xf32> to vector<48xf32>
    %90 = vector.shape_cast %89 : vector<48xf32> to vector<48x1xf32>
    %cst_34 = arith.constant 3.200000e+01 : f32
    %91 = vector.broadcast %cst_34 : f32 to vector<48x1xf32>
    %92 = arith.divf %90, %91 : vector<48x1xf32>
    %93 = vector.broadcast %92 : vector<48x1xf32> to vector<48x32xf32>
    %94 = arith.subf %88, %93 : vector<48x32xf32>
    %95 = arith.mulf %94, %94 : vector<48x32xf32>
    %cst_35 = arith.constant dense<0.000000e+00> : vector<48xf32>
    %96 = vector.multi_reduction <add>, %95, %cst_35 [1] : vector<48x32xf32> to vector<48xf32>
    %97 = vector.shape_cast %96 : vector<48xf32> to vector<48x1xf32>
    %cst_36 = arith.constant 0.0322580636 : f32
    %98 = vector.broadcast %cst_36 : f32 to vector<48x1xf32>
    %99 = arith.mulf %97, %98 : vector<48x1xf32>
    %100 = math.sqrt %99 : vector<48x1xf32>
    %cst_37 = arith.constant 9.99999997E-7 : f32
    %101 = vector.broadcast %cst_37 : f32 to vector<48x1xf32>
    %102 = arith.addf %100, %101 : vector<48x1xf32>
    %103 = tpu.reciprocal %102 {approx = true} : vector<48x1xf32> -> vector<48x1xf32>
    %c0_38 = arith.constant 0 : index
    %c0_39 = arith.constant 0 : index
    %104 = vector.load %arg11[%c0_38, %c0_39] : memref<1x32xf32, #tpu.memory_space<vmem>>, vector<1x32xf32>
    %105 = vector.broadcast %92 : vector<48x1xf32> to vector<48x32xf32>
    %106 = arith.subf %88, %105 : vector<48x32xf32>
    %107 = vector.broadcast %104 : vector<1x32xf32> to vector<48x32xf32>
    %108 = arith.mulf %107, %106 : vector<48x32xf32>
    %109 = vector.broadcast %103 : vector<48x1xf32> to vector<48x32xf32>
    %110 = arith.mulf %108, %109 : vector<48x32xf32>
    %c0_40 = arith.constant 0 : index
    %c0_41 = arith.constant 0 : index
    %111 = vector.load %arg12[%c0_40, %c0_41] : memref<1x32xf32, #tpu.memory_space<vmem>>, vector<1x32xf32>
    %112 = vector.broadcast %111 : vector<1x32xf32> to vector<48x32xf32>
    %113 = arith.addf %110, %112 : vector<48x32xf32>
    %c0_42 = arith.constant 0 : index
    %c0_43 = arith.constant 0 : index
    %c0_44 = arith.constant 0 : index
    %114 = vector.load %arg13[%c0_42, %c0_43, %c0_44] : memref<1x48x32xf32, #tpu.memory_space<vmem>>, vector<1x48x32xf32>
    %115 = vector.shape_cast %114 : vector<1x48x32xf32> to vector<48x32xf32>
    %116 = vector.shape_cast %113 : vector<48x32xf32> to vector<1x48x32xf32>
    tpu.vector_store %arg13[%c0_42, %c0_43, %c0_44], %116 {strides = array<i32>} : memref<1x48x32xf32, #tpu.memory_space<vmem>>, vector<1x48x32xf32>,
    return
  }
  func.func @transform_0(%arg0: i32) -> (i32, i32, i32, i32) {
    %c0_i32 = arith.constant 0 : i32
    %c0_i32_0 = arith.constant 0 : i32
    %c0_i32_1 = arith.constant 0 : i32
    %c0_i32_2 = arith.constant 0 : i32
    return %arg0, %c0_i32, %c0_i32_0, %c0_i32_1 : i32, i32, i32, i32
  }
  func.func @transform_1(%arg0: i32) -> (i32, i32) {
    %c0_i32 = arith.constant 0 : i32
    %c0_i32_0 = arith.constant 0 : i32
    %c0_i32_1 = arith.constant 0 : i32
    return %c0_i32, %c0_i32_0 : i32, i32
  }
  func.func @transform_2(%arg0: i32) -> (i32, i32) {
    %c0_i32 = arith.constant 0 : i32
    %c0_i32_0 = arith.constant 0 : i32
    %c0_i32_1 = arith.constant 0 : i32
    return %c0_i32, %c0_i32_0 : i32, i32
  }
  func.func @transform_3(%arg0: i32) -> (i32, i32) {
    %c0_i32 = arith.constant 0 : i32
    %c0_i32_0 = arith.constant 0 : i32
    %c0_i32_1 = arith.constant 0 : i32
    return %c0_i32, %c0_i32_0 : i32, i32
  }
  func.func @transform_4(%arg0: i32) -> (i32, i32) {
    %c0_i32 = arith.constant 0 : i32
    %c0_i32_0 = arith.constant 0 : i32
    %c0_i32_1 = arith.constant 0 : i32
    return %c0_i32, %c0_i32_0 : i32, i32
  }
  func.func @transform_5(%arg0: i32) -> (i32, i32) {
    %c0_i32 = arith.constant 0 : i32
    %c0_i32_0 = arith.constant 0 : i32
    %c0_i32_1 = arith.constant 0 : i32
    return %c0_i32, %c0_i32_0 : i32, i32
  }
  func.func @transform_6(%arg0: i32) -> (i32, i32) {
    %c0_i32 = arith.constant 0 : i32
    %c0_i32_0 = arith.constant 0 : i32
    %c0_i32_1 = arith.constant 0 : i32
    return %c0_i32, %c0_i32_0 : i32, i32
  }
  func.func @transform_7(%arg0: i32) -> (i32, i32) {
    %c0_i32 = arith.constant 0 : i32
    %c0_i32_0 = arith.constant 0 : i32
    %c0_i32_1 = arith.constant 0 : i32
    return %c0_i32, %c0_i32_0 : i32, i32
  }
  func.func @transform_8(%arg0: i32) -> (i32, i32) {
    %c0_i32 = arith.constant 0 : i32
    %c0_i32_0 = arith.constant 0 : i32
    %c0_i32_1 = arith.constant 0 : i32
    return %c0_i32, %c0_i32_0 : i32, i32
  }
  func.func @transform_9(%arg0: i32) -> (i32, i32) {
    %c0_i32 = arith.constant 0 : i32
    %c0_i32_0 = arith.constant 0 : i32
    %c0_i32_1 = arith.constant 0 : i32
    return %c0_i32, %c0_i32_0 : i32, i32
  }
  func.func @transform_10(%arg0: i32) -> (i32, i32) {
    %c0_i32 = arith.constant 0 : i32
    %c0_i32_0 = arith.constant 0 : i32
    %c0_i32_1 = arith.constant 0 : i32
    return %c0_i32, %c0_i32_0 : i32, i32
  }
  func.func @transform_11(%arg0: i32) -> (i32, i32) {
    %c0_i32 = arith.constant 0 : i32
    %c0_i32_0 = arith.constant 0 : i32
    %c0_i32_1 = arith.constant 0 : i32
    return %c0_i32, %c0_i32_0 : i32, i32
  }
  func.func @transform_12(%arg0: i32) -> (i32, i32, i32) {
    %c0_i32 = arith.constant 0 : i32
    %c0_i32_0 = arith.constant 0 : i32
    %c0_i32_1 = arith.constant 0 : i32
    return %arg0, %c0_i32, %c0_i32_0 : i32, i32, i32
  }
}

</mosaic_0001>

<bundles_post_ra>
// kernel: st_att_layer.1
= control target key start
LH: loop header
LB: loop body
LE: loop exit
PB: predicated region body
PF: predicated region fallthrough
CT: control target
= control target key end

     0   :  { %s5816_s21 = smov 0   ;;  %s7222_s0 = inlined_call_operand.vmem [shape: f32[2,8,8,128], index: 0, kind: input, shape index: {}]   ;;  %s7223_s1 = inlined_call_operand.vmem [shape: f32[8,128], index: 1, kind: input, shape index: {}]   ;;  %s7224_s2 = inlined_call_operand.vmem [shape: f32[8,128], index: 2, kind: input, shape index: {}]   ;;  %s7225_s3 = inlined_call_operand.vmem [shape: f32[24,24], index: 3, kind: input, shape index: {}]   ;;  %s7226_s4 = inlined_call_operand.vmem [shape: f32[128,96], index: 4, kind: input, shape index: {}]   ;;  %s7227_s5 = inlined_call_operand.vmem [shape: f32[1,96], index: 5, kind: input, shape index: {}]   ;;  %s7228_s6 = inlined_call_operand.vmem [shape: f32[8,24], index: 6, kind: input, shape index: {}]   ;;  %s7229_s7 = inlined_call_operand.vmem [shape: f32[8,1], index: 7, kind: input, shape index: {}]   ;;  %s7230_s8 = inlined_call_operand.vmem [shape: f32[32,32], index: 8, kind: input, shape index: {}]   ;;  %s7231_s9 = inlined_call_operand.vmem [shape: f32[1,32], index: 9, kind: input, shape index: {}]   ;;  %s7232_s10 = inlined_call_operand.vmem [shape: f32[1,32], index: 10, kind: input, shape index: {}]   ;;  %s7233_s11 = inlined_call_operand.vmem [shape: f32[1,32], index: 11, kind: input, shape index: {}]   ;;  %s7234_s12 = inlined_call_operand.vmem [shape: f32[2,48,32], index: 12, kind: output, shape index: {}]  }
   0x1 LB: > { %s4410_s22 = sadd.s32 4294967295, %s5738_s21   ;;  %p4414_p0 = scmp.ge.s32.totalorder %s5738_s21, 1  ;;  %s5738_s21 = sphi %s5816_s21, %s22_s21  }
   0x2   : > { %p362_p1 = scmp.lt.s32.totalorder %s5738_s21, 3 }
   0x4   : > { %p363_p2 = pnand %p4414_p0, %p362_p1 }
   0x6   : > { %366 = sbr.rel (%p363_p2) target bundleno = 2691 (0xa83), region = 68 }
   0xd   : > { %v530_v0 = vld [vmem:[%s7226_s4] sm:$0xff]  ;;  %v531_v1 = vld [vmem:[%s7226_s4 + $0x8] sm:$0xff]  ;;  %v532_v2 = vld [vmem:[%s7226_s4 + $0x10] sm:$0xff]  ;;  %p404_p3 = scmp.lt.s32.totalorder %s4410_s22, 1  ;;  %v437_v3 = vlaneseq  ;;  %v5740_v6 = vmov 1966171168  }
   0xe   : > { %v5247_v4 = vpack.c.bf16 %v531_v1, %v530_v0  ;;  %v533_v5 = vld [vmem:[%s7226_s4 + $0x18] sm:$0xff]  ;;  %v435_v7 = vunpack.c.l.s4 %v5740_v6  ;;  %v534_v9 = vld [vmem:[%s7226_s4 + $0x20] sm:$0xff]  ;;  %v535_v10 = vld [vmem:[%s7226_s4 + $0x28] sm:$0xff]  ;;  %vm5743_vm0 = vmmov 0   ;;  %s5745_s16 = smov 64   ;;  %s5747_s18 = smov 112  }
   0xf   : > { %v5251_v8 = vpack.c.bf16 %v533_v5, %v532_v2  ;;  %s7269_s22 = smov (!%p404_p3, %s4410_s22), 1  ;;  %v438_v11 = vshrl.u32 %v437_v3, 7  ;;  %v5255_v13 = vpack.c.bf16 %v535_v10, %v534_v9  ;;  %v536_v14 = vld [vmem:[%s7226_s4 + $0x30] sm:$0xff]  ;;  %v431_v15 = vld [vmem:[%s7224_s2] sm:$0xff]  ;;  %v537_v17 = vld [vmem:[%s7226_s4 + $0x38] sm:$0xff]  ;;  %vm738_vm1 = vcmask 130048  }
  0x10   : > { %5248 = vmatprep.subr.bf16.mxu0 %v5247_v4  ;;  %v436_v12 = vunpack.c.0.s8 %v435_v7  ;;  %s4544_s17 = sshll.u32 %s7269_s22, 6  ;;  %v5865_v19 = vld [vmem:[%s7223_s1] sm:$0xff]  ;;  %v5259_v22 = vpack.c.bf16 %v537_v17, %v536_v14  ;;  %v539_v26 = vld [vmem:[%s7226_s4 + $0x48] sm:$0xff]  ;;  %v540_v30 = vld [vmem:[%s7226_s4 + $0x50] sm:$0xff]  ;;  %v433_v46 = vcombine.high %v431_v15, %v431_v15  ;;  %v7239_v14 = vmov 0.0|0.0   ;;  %s5748_s28 = smov 48  }
  0x11   : > { %5250 = vmatpush3.bf16.msra.mxu0 %v5247_v4  ;;  %s5851_s24 = scalar_lea.vmem %s7222_s0, %s4544_s17  ;;  %v5868_v21 = vsub.s32 0, %v438_v11  ;;  %v538_v25 = vld [vmem:[%s7226_s4 + $0x40] sm:$0xff]  ;;  %v541_v31 = vld [vmem:[%s7226_s4 + $0x58] sm:$0xff]  ;;  %v543_v34 = vld [vmem:[%s7226_s4 + $0x68] sm:$0xff]  ;;  %5279 = vmatprep.subr.bf16.mxu1 %v7239_v14  ;;  %s5746_s17 = smov 80   ;;  %vm1336_vm3 = vcmask 195584  }
  0x12   : > { %5252 = vmatprep.subr.bf16.mxu0 %v5251_v8  ;;  %v5856_v16 = vsub.s32 %v436_v12, %v438_v11  ;;  %v414_v18 = vld [vmem:[%s5851_s24] sm:$0xff]  ;;  %v5263_v28 = vpack.c.bf16 %v539_v26, %v538_v25  ;;  %v5267_v32 = vpack.c.bf16 %v541_v31, %v540_v30  ;;  %v544_v37 = vld [vmem:[%s7226_s4 + $0x70] sm:$0xff]  ;;  %v545_v38 = vld [vmem:[%s7226_s4 + $0x78] sm:$0xff]  ;;  %v7241_v26 = vmov 0.0  }
  0x13   : > { %v423_v23 = vadd.f32 %v5865_v19, %v414_v18  ;;  %v542_v33 = vld [vmem:[%s7226_s4 + $0x60] sm:$0xff]  ;;  %v415_v41 = vld [vmem:[%s5851_s24 + $0x8] sm:$0xff]  ;;  %v5275_v42 = vpack.c.bf16 %v545_v38, %v544_v37  ;;  %v416_v43 = vld [vmem:[%s5851_s24 + $0x10] sm:$0xff]  ;;  %4822 = vmatprep.mubr.msk.f32.mxu1 %vm5743_vm0, %v7241_v26  ;;  %vm4082_vm4 = vcmask 261120  }
  0x14   : > { %v440_v20 = vrot.slane %v431_v15, %v5856_v16  ;;  %v5271_v36 = vpack.c.bf16 %v543_v34, %v542_v33  ;;  %v424_v44 = vadd.f32 %v5865_v19, %v415_v41  ;;  %v425_v47 = vadd.f32 %v5865_v19, %v416_v43  ;;  %v417_v52 = vld [vmem:[%s5851_s24 + $0x18] sm:$0xff]  ;;  %v418_v57 = vld [vmem:[%s5851_s24 + $0x20] sm:$0xff]  ;;  %v419_v0 = vld [vmem:[%s5851_s24 + $0x28] sm:$0xff] }
  0x15   : > { %5254 = vmatpush3.bf16.msra.mxu0 %v5251_v8  ;;  %v447_v53 = vrot.slane %v433_v46, %v5856_v16  ;;  %v426_v54 = vadd.f32 %v5865_v19, %v417_v52  ;;  %v427_v60 = vadd.f32 %v5865_v19, %v418_v57  ;;  %v428_v1 = vadd.f32 %v5865_v19, %v419_v0  ;;  %v420_v4 = vld [vmem:[%s5851_s24 + $0x30] sm:$0xff]  ;;  %v421_v10 = vld [vmem:[%s5851_s24 + $0x38] sm:$0xff]  ;;  %v5927_v15 = vld [vmem:[%s7227_s5] ss:$0 sm:$0xff]  ;;  %s5742_s24 = smov 96  }
  0x16   : > { %5256 = vmatprep.subr.bf16.mxu0 %v5255_v13  ;;  %v456_v24 = vrot.slane %v440_v20, %v5856_v16  ;;  %v448_v35 = vcombine.high %v440_v20, %v440_v20  ;;  %v429_v6 = vadd.f32 %v5865_v19, %v420_v4  ;;  %v430_v11 = vadd.f32 %v5865_v19, %v421_v10  ;;  %vm6107_vm2 = vmpackc.low %vm738_vm1, %vm738_vm1 }
  0x17   : > { %v463_v56 = vrot.slane %v447_v53, %v5856_v16  ;;  %v449_v59 = vcombine.high %v447_v53, %v447_v53 }
  0x18   : > { %v485_v27 = vrot.slane %v456_v24, %v5868_v21  ;;  %v470_v39 = vrot.slane %v448_v35, %v5856_v16  ;;  %v478_v40 = vcombine.high %v456_v24, %v456_v24 }
  0x19   : > { %5258 = vmatpush3.bf16.msra.mxu0 %v5255_v13  ;;  %v501_v61 = vrot.slane %v463_v56, %v5868_v21  ;;  %v477_v62 = vrot.slane %v449_v59, %v5856_v16  ;;  %v479_v3 = vcombine.high %v463_v56, %v463_v56 }
  0x1a   : > { %5260 = vmatprep.subr.bf16.mxu0 %v5259_v22  ;;  %v522_v29 = vadd.f32 %v485_v27, %v423_v23  ;;  %v489_v45 = vrot.slane %v470_v39, %v5868_v21  ;;  %v493_v48 = vrot.slane %v478_v40, %v5868_v21  ;;  %v480_v50 = vcombine.high %v470_v39, %v470_v39 }
  0x1b   : > { %v526_v63 = vadd.f32 %v501_v61, %v427_v60  ;;  %v505_v2 = vrot.slane %v477_v62, %v5868_v21  ;;  %v509_v7 = vrot.slane %v479_v3, %v5868_v21  ;;  %v481_v8 = vcombine.high %v477_v62, %v477_v62 }
  0x1c   : > { %4789 = vmatprep.mubr.f32.mxu0 %v522_v29  ;;  %v523_v49 = vadd.f32 %v489_v45, %v424_v44  ;;  %v524_v51 = vadd.f32 %v493_v48, %v425_v47  ;;  %v497_v55 = vrot.slane %v480_v50, %v5868_v21 }
  0x1d   : > { %5262 = vmatpush3.bf16.msra.mxu0 %v5259_v22  ;;  %v527_v5 = vadd.f32 %v505_v2, %v428_v1  ;;  %v528_v9 = vadd.f32 %v509_v7, %v429_v6  ;;  %v513_v12 = vrot.slane %v481_v8, %v5868_v21 }
  0x1e   : > { %5264 = vmatprep.subr.bf16.mxu0 %v5263_v28  ;;  %v525_v58 = vadd.f32 %v497_v55, %v426_v54 }
  0x1f   : > { %v529_v13 = vadd.f32 %v513_v12, %v430_v11 }
  0x21   : > { %5266 = vmatpush3.bf16.msra.mxu0 %v5263_v28 }
  0x22   : > { %5268 = vmatprep.subr.bf16.mxu0 %v5267_v32 }
  0x25   : > { %5270 = vmatpush3.bf16.msra.mxu0 %v5267_v32 }
  0x26   : > { %5272 = vmatprep.subr.bf16.mxu0 %v5271_v36 }
  0x29   : > { %5274 = vmatpush3.bf16.msra.mxu0 %v5271_v36 }
  0x2a   : > { %5276 = vmatprep.subr.bf16.mxu0 %v5275_v42 }
  0x2d   : > { %5278 = vmatpush3.bf16.msra.mxu0 %v5275_v42 }
  0x2e   : > { %5299 = vmatprep.subr.bf16.mxu0 %v7239_v14 }
  0x30   : > { %4790 = vmatmul.mubr.f32.vlgmr.msra.gmra.mrb[0].mxu0 %v523_v49 }
  0x31   : > { %4792 = vmatprep.mubr.f32.mxu0 %v524_v51 }
  0x34   : > { %4793 = vmatmul.mubr.f32.gmra.mrb[2].mxu0 %v523_v49 }
  0x35   : > { %4795 = vmatprep.mubr.f32.mxu0 %v524_v51 }
  0x38   : > { %4796 = vmatmul.mubr.f32.gmra.mrb[4].mxu0 %v525_v58 }
  0x39   : > { %4798 = vmatprep.mubr.f32.mxu0 %v524_v51 }
  0x3c   : > { %4799 = vmatmul.mubr.f32.gmra.mrb[6].mxu0 %v525_v58 }
  0x3d   : > { %4801 = vmatprep.mubr.f32.mxu0 %v526_v63 }
  0x40   : > { %4802 = vmatmul.mubr.f32.gmra.mrb[8].mxu0 %v525_v58 }
  0x41   : > { %4804 = vmatprep.mubr.f32.mxu0 %v526_v63 }
  0x44   : > { %4805 = vmatmul.mubr.f32.gmra.mrb[10].mxu0 %v527_v5 }
  0x45   : > { %4807 = vmatprep.mubr.f32.mxu0 %v526_v63 }
  0x48   : > { %4808 = vmatmul.mubr.f32.gmra.mrb[12].mxu0 %v527_v5 }
  0x49   : > { %4810 = vmatprep.mubr.f32.mxu0 %v528_v9 }
  0x4c   : > { %4811 = vmatmul.mubr.f32.gmra.mrb[14].mxu0 %v527_v5 }
  0x4d   : > { %4813 = vmatprep.mubr.f32.mxu0 %v528_v9 }
  0x50   : > { %4814 = vmatmul.mubr.f32.gmra.mrb[16].mxu0 %v529_v13 }
  0x51   : > { %4897 = vmatprep.mubr.msk.f32.mxu0 %vm5743_vm0, %v7241_v26 }
 0x103   : > { %v4791_v16 = vpop.f32.mrb[0].mxu0 }
 0x104   : > { %v5930_v17 = vadd.f32 %v4791_v16, %v5927_v15  ;;  %v619_v18 = vpop.f32.mrb[1].mxu0 }
 0x105   : > { %v5933_v19 = vadd.f32 %v5927_v15, %v619_v18 }
 0x106   : > { %v709_v20 = vmax.f32 %v5930_v17, 0.0 }
 0x107   : > { %v4794_v21 = vpop.f32.mrb[2].mxu0  ;;  %v5938_v22 = vpack.i.bf16 %v5930_v17, %v5933_v19  ;;  %v708_v23 = vmax.f32 %v5933_v19, 0.0 }
 0x108   : > { %v629_v24 = vpop.f32.mrb[3].mxu0  ;;  %v5950_v27 = vadd.f32 %v4794_v21, %v5927_v15 }
 0x109   : > { %5410 = vrot.lane.b32.xlu0 %v5938_v22, %s5742_s24  ;;  %v5943_v25 = vpack.i.bf16 %v709_v20, %v708_v23  ;;  %v5953_v28 = vadd.f32 %v5927_v15, %v629_v24 }
 0x10a   : > { %v711_v34 = vmax.f32 %v5950_v27, 0.0 }
 0x10b   : > { %v4797_v29 = vpop.f32.mrb[4].mxu0  ;;  %v7238_v13 = vmax.f32 %v5953_v28, 0.0 }
 0x10c   : > { %v639_v30 = vpop.f32.mrb[5].mxu0  ;;  %v5978_v41 = vadd.f32 %v4797_v29, %v5927_v15 }
 0x10d   : > { %v5956_v31 = vadd.f32 %v5927_v15, %v639_v30  ;;  %736 = vrot.lane.b32.xlu0 %v5953_v28, %s5742_s24 }
 0x10e   : > { %v7244_v16 = vmax.f32 %v5978_v41, 0.0 }
 0x10f   : > { %v4800_v32 = vpop.f32.mrb[6].mxu0  ;;  %v5962_v33 = vpack.i.bf16 %v5956_v31, %v5950_v27  ;;  %v712_v35 = vmax.f32 %v5956_v31, 0.0 }
 0x110   : > { %v5967_v36 = vadd.f32 %v4800_v32, %v5927_v15  ;;  %v649_v37 = vpop.f32.mrb[7].mxu0 }
 0x111   : > { %v5970_v38 = vadd.f32 %v5927_v15, %v649_v37  ;;  %5415 = vrot.lane.b32.xlu1 %v5962_v33, %s5742_s24  ;;  %v5974_v39 = vpack.i.bf16 %v712_v35, %v711_v34 }
 0x112   : > { %v715_v40 = vmax.f32 %v5967_v36, 0.0 }
 0x113   : > { %v4803_v42 = vpop.f32.mrb[8].mxu0  ;;  %v5982_v43 = vpack.i.bf16 %v5967_v36, %v5970_v38  ;;  %v714_v44 = vmax.f32 %v5970_v38, 0.0 }
 0x114   : > { %v659_v45 = vpop.f32.mrb[9].mxu0  ;;  %v5992_v47 = vadd.f32 %v4803_v42, %v5927_v15 }
 0x115   : > { %838 = vrot.lane.b32.xlu1 %v5978_v41, %s5742_s24  ;;  %5420 = vrot.lane.b32.xlu0 %v5982_v43, %s5742_s24  ;;  %v5989_v46 = vpack.i.bf16 %v715_v40, %v714_v44  ;;  %v5995_v48 = vadd.f32 %v5927_v15, %v659_v45 }
 0x116   : > { %v717_v55 = vmax.f32 %v5992_v47, 0.0 }
 0x117   : > { %v4806_v49 = vpop.f32.mrb[10].mxu0 }
 0x118   : > { %v669_v50 = vpop.f32.mrb[11].mxu0  ;;  %v6003_v52 = vadd.f32 %v4806_v49, %v5927_v15 }
 0x119   : > { %v5998_v51 = vadd.f32 %v5927_v15, %v669_v50  ;;  %939 = vrot.lane.b32.xlu1 %v5995_v48, %s5742_s24 }
 0x11a   : > { %v7243_v18 = vmax.f32 %v6003_v52, 0.0 }
 0x11b   : > { %v4809_v53 = vpop.f32.mrb[12].mxu0  ;;  %v5424_v54 = vpack.i.bf16 %v5998_v51, %v5992_v47  ;;  %v718_v56 = vmax.f32 %v5998_v51, 0.0 }
 0x11c   : > { %v6010_v57 = vadd.f32 %v4809_v53, %v5927_v15  ;;  %v679_v58 = vpop.f32.mrb[13].mxu0 }
 0x11d   : > { %v6013_v59 = vadd.f32 %v5927_v15, %v679_v58  ;;  %1040 = vrot.lane.b32.xlu1 %v6003_v52, %s5742_s24  ;;  %5425 = vrot.lane.b32.xlu0 %v5424_v54, %s5742_s24  ;;  %v6018_v60 = vpack.i.bf16 %v718_v56, %v717_v55 }
 0x11e   : > { %v721_v61 = vmax.f32 %v6010_v57, 0.0 }
 0x11f   : > { %v4812_v62 = vpop.f32.mrb[14].mxu0  ;;  %v6023_v63 = vpack.i.bf16 %v6010_v57, %v6013_v59  ;;  %v720_v0 = vmax.f32 %v6013_v59, 0.0 }
 0x120   : > { %v689_v1 = vpop.f32.mrb[15].mxu0  ;;  %v6031_v3 = vadd.f32 %v4812_v62, %v5927_v15 }
 0x121   : > { %5430 = vrot.lane.b32.xlu0 %v6023_v63, %s5742_s24  ;;  %v6028_v2 = vpack.i.bf16 %v721_v61, %v720_v0  ;;  %v6034_v4 = vadd.f32 %v5927_v15, %v689_v1 }
 0x122   : > { %v723_v9 = vmax.f32 %v6031_v3, 0.0 }
 0x123   : > { %7248 = vst [vmem:[#allocation2_spill] sm:$0xff] %v6028_v2  ;;  %v4815_v5 = vpop.f32.mrb[16].mxu0  ;;  %v7235_v20 = vmax.f32 %v6034_v4, 0.0 }
 0x124   : > { %v699_v6 = vpop.f32.mrb[17].mxu0  ;;  %v6054_v12 = vadd.f32 %v4815_v5, %v5927_v15 }
 0x125   : > { %v6037_v7 = vadd.f32 %v5927_v15, %v699_v6  ;;  %1141 = vrot.lane.b32.xlu0 %v6034_v4, %s5742_s24  ;;  %v7237_v15 = vmax.f32 %v5995_v48, 0.0 }
 0x126   : > { %v7236_v21 = vmax.f32 %v6054_v12, 0.0 }
 0x127   : > { %v6043_v8 = vpack.i.bf16 %v6037_v7, %v6031_v3  ;;  %v724_v10 = vmax.f32 %v6037_v7, 0.0 }
 0x129   : > { %5435 = vrot.lane.b32.xlu1 %v6043_v8, %s5742_s24  ;;  %5440 = vrot.lane.b32.xlu0 %v5943_v25, %s5745_s16  ;;  %v6051_v11 = vpack.i.bf16 %v724_v10, %v723_v9 }
 0x12b   : > { %7249 = vst [vmem:[#allocation3_spill] sm:$0xff] %v6051_v11 }
 0x12d   : > { %1242 = vrot.lane.b32.xlu1 %v6054_v12, %s5742_s24  ;;  %1542 = vrot.lane.b32.xlu0 %v7238_v13, %s5745_s16 }
 0x131   : > { %5445 = vrot.lane.b32.xlu1 %v5974_v39, %s5745_s16  ;;  %5450 = vrot.lane.b32.xlu0 %v5989_v46, %s5745_s16 }
 0x135   : > { %1643 = vrot.lane.b32.xlu1 %v7244_v16, %s5745_s16  ;;  %1744 = vrot.lane.b32.xlu0 %v7237_v15, %s5745_s16 }
 0x139   : > { %5455 = vrot.lane.b32.xlu1 %v6018_v60, %s5745_s16  ;;  %5460 = vrot.lane.b32.xlu0 %v6028_v2, %s5745_s16 }
 0x13d   : > { %1845 = vrot.lane.b32.xlu1 %v7243_v18, %s5745_s16  ;;  %1946 = vrot.lane.b32.xlu0 %v7235_v20, %s5745_s16 }
 0x141   : > { %5470 = vrot.lane.b32.xlu1 %v5962_v33, %s5746_s17  ;;  %5465 = vrot.lane.b32.xlu0 %v5938_v22, %s5746_s17 }
 0x145   : > { %2255 = vrot.lane.b32.xlu1 %v5978_v41, %s5746_s17  ;;  %2151 = vrot.lane.b32.xlu0 %v5953_v28, %s5746_s17 }
 0x149   : > { %2141 = vrot.lane.b32.xlu1 %v5933_v19, %s5747_s18  ;;  %5475 = vrot.lane.b32.xlu0 %v5982_v43, %s5746_s17 }
 0x14d   : > { %2047 = vrot.lane.b32.xlu1 %v7236_v21, %s5745_s16  ;;  %5480 = vrot.lane.b32.xlu0 %v5424_v54, %s5746_s17 }
 0x151   : > { %5485 = vrot.lane.b32.xlu1 %v6051_v11, %s5745_s16  ;;  %s5749_s16 = smov 16  }
 0x17b   : > { %v5411_v22 = vpop.permute.xlu0 %5410 }
 0x17c   : > { %v5413_v23 = vunpack.i.h.bf16 %v5411_v22  ;;  %v5412_v24 = vunpack.i.l.bf16 %v5411_v22 }
 0x17e   : > { %v5280_v30 = vpack.c.bf16 %v5413_v23, %v5412_v24 }
 0x17f   : > { %v737_v35 = vpop.permute.xlu0 %736 }
 0x180   : > { %5282 = vmatpush3.bf16.xpose.msk.msra.mxu1 %vm6107_vm2, %v5280_v30 }
 0x181   : > { %4820 = vmatprep.subr.mxu1 %v7241_v26 }
 0x183   : > { %v5416_v32 = vpop.permute.xlu1 %5415 }
 0x184   : > { %v5418_v33 = vunpack.i.h.bf16 %v5416_v32  ;;  %v5417_v34 = vunpack.i.l.bf16 %v5416_v32 }
 0x186   : > { %v5284_v37 = vpack.c.bf16 %v5418_v33, %v5417_v34 }
 0x187   : > { %v839_v40 = vpop.permute.xlu1 %838  ;;  %v5421_v42 = vpop.permute.xlu0 %5420 }
 0x188   : > { %4821 = vmatpush3.xpose.msk.msra.mxu1 %vm738_vm1, %v737_v35  ;;  %v5423_v44 = vunpack.i.h.bf16 %v5421_v42  ;;  %v5422_v45 = vunpack.i.l.bf16 %v5421_v42  ;;  %v6220_v42 = vld [vmem:[%s7225_s3] sm:$0xff] }
 0x189   : > { %5283 = vmatprep.subr.bf16.mxu1 %v7239_v14 }
 0x18b   : > { %4823 = vmatmul.mubr.msk.f32.vlgmr.msra.gmra.mrb[0].mxu1 %vm738_vm1, %v5933_v19  ;;  %v940_v43 = vpop.permute.xlu1 %939  ;;  %v5288_v19 = vpack.c.bf16 %v5423_v44, %v5422_v45 }
 0x18c   : > { %5286 = vmatpush3.bf16.xpose.msk.msra.mxu1 %vm6107_vm2, %v5284_v37  ;;  %4825 = vmatprep.mubr.msk.f32.mxu1 %vm5743_vm0, %v7241_v26 }
 0x18d   : > { %4835 = vmatprep.subr.mxu1 %v7241_v26 }
 0x18f   : > { %4826 = vmatmul.mubr.msk.f32.gmra.mrb[2].mxu1 %vm738_vm1, %v5930_v17  ;;  %v1041_v49 = vpop.permute.xlu1 %1040  ;;  %v5426_v50 = vpop.permute.xlu0 %5425 }
 0x190   : > { %4828 = vmatprep.mubr.msk.f32.mxu1 %vm5743_vm0, %v7241_v26  ;;  %v5428_v56 = vunpack.i.h.bf16 %v5426_v50  ;;  %v5427_v58 = vunpack.i.l.bf16 %v5426_v50 }
 0x192   : > { %v5292_v0 = vpack.c.bf16 %v5428_v56, %v5427_v58 }
 0x193   : > { %4829 = vmatmul.mubr.msk.f32.gmra.mrb[4].mxu1 %vm738_vm1, %v5953_v28  ;;  %v5431_v9 = vpop.permute.xlu0 %5430 }
 0x194   : > { %4836 = vmatpush3.xpose.msk.msra.mxu1 %vm738_vm1, %v839_v40  ;;  %4837 = vmatprep.mubr.msk.f32.mxu1 %vm5743_vm0, %v7241_v26  ;;  %v5433_v10 = vunpack.i.h.bf16 %v5431_v9  ;;  %v5432_v22 = vunpack.i.l.bf16 %v5431_v9 }
 0x195   : > { %5287 = vmatprep.subr.bf16.mxu1 %v7239_v14 }
 0x196   : > { %v5296_v30 = vpack.c.bf16 %v5433_v10, %v5432_v22 }
 0x197   : > { %4838 = vmatmul.mubr.msk.f32.vlgmr.msra.gmra.mrb[6].mxu1 %vm738_vm1, %v5950_v27  ;;  %v1142_v24 = vpop.permute.xlu0 %1141 }
 0x198   : > { %5290 = vmatpush3.bf16.xpose.msk.msra.mxu1 %vm6107_vm2, %v5288_v19  ;;  %4840 = vmatprep.mubr.msk.f32.mxu1 %vm5743_vm0, %v7241_v26  ;;  %v6228_v19 = vld [vmem:[%s7225_s3 + $0x8] sm:$0xff] }
 0x199   : > { %4850 = vmatprep.subr.mxu1 %v7241_v26 }
 0x19b   : > { %v5436_v53 = vpop.permute.xlu1 %5435  ;;  %4841 = vmatmul.mubr.msk.f32.gmra.mrb[8].mxu1 %vm738_vm1, %v5956_v31  ;;  %v5441_v33 = vpop.permute.xlu0 %5440 }
 0x19c   : > { %v5438_v54 = vunpack.i.h.bf16 %v5436_v53  ;;  %v5437_v55 = vunpack.i.l.bf16 %v5436_v53  ;;  %4843 = vmatprep.mubr.msk.f32.mxu1 %vm5743_vm0, %v7241_v26  ;;  %v5443_v34 = vunpack.i.h.bf16 %v5441_v33  ;;  %v5442_v35 = vunpack.i.l.bf16 %v5441_v33 }
 0x19e   : > { %v5300_v61 = vpack.c.bf16 %v5438_v54, %v5437_v55  ;;  %v5304_v37 = vpack.c.bf16 %v5443_v34, %v5442_v35  ;;  %v6238_v55 = vld [vmem:[%s7225_s3 + $0x10] sm:$0xff] }
 0x19f   : > { %v1243_v62 = vpop.permute.xlu1 %1242  ;;  %4844 = vmatmul.mubr.msk.f32.gmra.mrb[10].mxu1 %vm738_vm1, %v5978_v41  ;;  %v1543_v40 = vpop.permute.xlu0 %1542 }
 0x1a0   : > { %4851 = vmatpush3.xpose.msk.msra.mxu1 %vm738_vm1, %v940_v43  ;;  %5302 = vmatpush3.bf16.xpose.msk.msra.mxu0 %vm6107_vm2, %v5300_v61 }
 0x1a1   : > { %4852 = vmatprep.mubr.msk.f32.mxu1 %vm5743_vm0, %v7241_v26  ;;  %5291 = vmatprep.subr.bf16.mxu1 %v7239_v14 }
 0x1a2   : > { %4895 = vmatprep.subr.mxu0 %v7241_v26 }
 0x1a3   : > { %v5446_v1 = vpop.permute.xlu1 %5445  ;;  %4853 = vmatmul.mubr.msk.f32.vlgmr.msra.gmra.mrb[12].mxu1 %vm738_vm1, %v5970_v38 }
 0x1a4   : > { %5294 = vmatpush3.bf16.xpose.msk.msra.mxu1 %vm6107_vm2, %v5292_v0  ;;  %4855 = vmatprep.mubr.msk.f32.mxu1 %vm5743_vm0, %v7241_v26  ;;  %v5448_v5 = vunpack.i.h.bf16 %v5446_v1  ;;  %v5447_v6 = vunpack.i.l.bf16 %v5446_v1 }
 0x1a5   : > { %4865 = vmatprep.subr.mxu1 %v7241_v26 }
 0x1a6   : > { %v5307_v23 = vpack.c.bf16 %v5448_v5, %v5447_v6 }
 0x1a7   : > { %4856 = vmatmul.mubr.msk.f32.gmra.mrb[14].mxu1 %vm738_vm1, %v5967_v36  ;;  %v1644_v32 = vpop.permute.xlu1 %1643 }
 0x1a8   : > { %4896 = vmatpush3.xpose.msk.msra.mxu0 %vm738_vm1, %v1243_v62  ;;  %4858 = vmatprep.mubr.msk.f32.mxu1 %vm5743_vm0, %v7241_v26 }
 0x1a9   : > { %5306 = vmatprep.subr.bf16.mxu0 %v7239_v14 }
 0x1ab   : > { %4898 = vmatmul.mubr.msk.f32.vlgmr.msra.gmra.mrb[18].mxu0 %vm738_vm1, %v6031_v3  ;;  %4859 = vmatmul.mubr.msk.f32.gmra.mrb[16].mxu1 %vm738_vm1, %v5995_v48 }
 0x1ac   : > { %4866 = vmatpush3.xpose.msk.msra.mxu1 %vm738_vm1, %v1041_v49  ;;  %5308 = vmatpush3.bf16.msra.mxu0 %v5307_v23 }
 0x1ad   : > { %4867 = vmatprep.mubr.msk.f32.mxu1 %vm5743_vm0, %v7241_v26  ;;  %4900 = vmatprep.mubr.msk.f32.mxu0 %vm5743_vm0, %v7241_v26 }
 0x1ae   : > { %5295 = vmatprep.subr.bf16.mxu1 %v7239_v14  ;;  %4925 = vmatprep.subr.mxu0 %v7241_v26 }
 0x1af   : > { %4901 = vmatmul.mubr.msk.f32.gmra.mrb[20].mxu0 %vm738_vm1, %v6037_v7  ;;  %4868 = vmatmul.mubr.msk.f32.vlgmr.msra.gmra.mrb[18].mxu1 %vm738_vm1, %v5992_v47 }
 0x1b0   : > { %5298 = vmatpush3.bf16.xpose.msk.msra.mxu1 %vm6107_vm2, %v5296_v30  ;;  %4926 = vmatpush3.msra.mxu0 %v1644_v32 }
 0x1b1   : > { %4870 = vmatprep.mubr.msk.f32.mxu1 %vm5743_vm0, %v7241_v26  ;;  %4903 = vmatprep.mubr.msk.f32.mxu0 %vm5743_vm0, %v7241_v26 }
 0x1b2   : > { %4880 = vmatprep.subr.mxu1 %v7241_v26  ;;  %5312 = vmatprep.subr.bf16.mxu0 %v7239_v14 }
 0x1b3   : > { %4904 = vmatmul.mubr.msk.f32.gmra.mrb[22].mxu0 %vm738_vm1, %v6054_v12  ;;  %4871 = vmatmul.mubr.msk.f32.gmra.mrb[20].mxu1 %vm738_vm1, %v5998_v51 }
 0x1b4   : > { %4873 = vmatprep.mubr.msk.f32.mxu1 %vm5743_vm0, %v7241_v26  ;;  %4927 = vmatprep.mubr.msk.f32.mxu0 %vm5743_vm0, %v7241_v26 }
 0x1b7   : > { %4874 = vmatmul.mubr.msk.f32.gmra.mrb[22].mxu1 %vm738_vm1, %v6003_v52 }
 0x1b8   : > { %4881 = vmatpush3.xpose.msk.msra.mxu1 %vm738_vm1, %v1142_v24  ;;  %4882 = vmatprep.mubr.msk.f32.mxu1 %vm5743_vm0, %v7241_v26 }
 0x1b9   : > { %5303 = vmatprep.subr.bf16.mxu1 %v7239_v14 }
 0x1bb   : > { %4883 = vmatmul.mubr.msk.f32.vlgmr.msra.gmra.mrb[24].mxu1 %vm738_vm1, %v6013_v59 }
 0x1bc   : > { %5305 = vmatpush3.bf16.msra.mxu1 %v5304_v37  ;;  %4885 = vmatprep.mubr.msk.f32.mxu1 %vm5743_vm0, %v7241_v26 }
 0x1bd   : > { %4910 = vmatprep.subr.mxu1 %v7241_v26 }
 0x1bf   : > { %4886 = vmatmul.mubr.msk.f32.gmra.mrb[26].mxu1 %vm738_vm1, %v6010_v57 }
 0x1c0   : > { %4911 = vmatpush3.msra.mxu1 %v1543_v40  ;;  %4888 = vmatprep.mubr.msk.f32.mxu1 %vm5743_vm0, %v7241_v26 }
 0x1c1   : > { %5309 = vmatprep.subr.bf16.mxu1 %v7239_v14 }
 0x1c3   : > { %4889 = vmatmul.mubr.msk.f32.gmra.mrb[28].mxu1 %vm738_vm1, %v6034_v4 }
 0x1c4   : > { %4912 = vmatprep.mubr.msk.f32.mxu1 %vm5743_vm0, %v7241_v26 }
 0x25e   : > { %v817_v43 = vpop.f32.mrb[0].mxu1 }
 0x25f   : > { %v6223_v44 = vadd.f32 %v817_v43, %v6220_v42  ;;  %v4824_v45 = vpop.f32.mrb[1].mxu1 }
 0x261   : > { %v1337_v49 = vsel %vm1336_vm3, %v6223_v44, -inf }
 0x262   : > { %v822_v50 = vpop.f32.mrb[2].mxu1  ;;  %1338 = vmax.xlane.f32.xlu0 %v1337_v49 }
 0x263   : > { %v6233_v53 = vadd.f32 %v822_v50, %v6228_v19  ;;  %v4827_v54 = vpop.f32.mrb[3].mxu1 }
 0x265   : > { %v1340_v56 = vsel %vm1336_vm3, %v6233_v53, -inf }
 0x266   : > { %v827_v58 = vpop.f32.mrb[4].mxu1  ;;  %1341 = vmax.xlane.f32.xlu0 %v1340_v56 }
 0x267   : > { %v6243_v61 = vadd.f32 %v827_v58, %v6238_v55  ;;  %v4830_v62 = vpop.f32.mrb[5].mxu1 }
 0x269   : > { %v1343_v0 = vsel %vm1336_vm3, %v6243_v61, -inf }
 0x26a   : > { %1344 = vmax.xlane.f32.xlu1 %v1343_v0  ;;  %v918_v1 = vpop.f32.mrb[6].mxu1 }
 0x26b   : > { %v6248_v5 = vadd.f32 %v918_v1, %v6220_v42  ;;  %v4839_v6 = vpop.f32.mrb[7].mxu1 }
 0x26d   : > { %v1346_v9 = vsel %vm1336_vm3, %v6248_v5, -inf }
 0x26e   : > { %1347 = vmax.xlane.f32.xlu1 %v1346_v9  ;;  %v923_v10 = vpop.f32.mrb[8].mxu1 }
 0x26f   : > { %v6253_v22 = vadd.f32 %v923_v10, %v6228_v19  ;;  %v4842_v23 = vpop.f32.mrb[9].mxu1 }
 0x271   : > { %v1349_v24 = vsel %vm1336_vm3, %v6253_v22, -inf }
 0x272   : > { %v928_v30 = vpop.f32.mrb[10].mxu1  ;;  %1350 = vmax.xlane.f32.xlu0 %v1349_v24 }
 0x273   : > { %v6258_v32 = vadd.f32 %v928_v30, %v6238_v55  ;;  %v4845_v33 = vpop.f32.mrb[11].mxu1 }
 0x275   : > { %v1352_v34 = vsel %vm1336_vm3, %v6258_v32, -inf }
 0x276   : > { %v1019_v35 = vpop.f32.mrb[12].mxu1  ;;  %1353 = vmax.xlane.f32.xlu0 %v1352_v34 }
 0x277   : > { %v6263_v37 = vadd.f32 %v1019_v35, %v6220_v42  ;;  %v4854_v40 = vpop.f32.mrb[13].mxu1 }
 0x279   : > { %v1355_v43 = vsel %vm1336_vm3, %v6263_v37, -inf }
 0x27a   : > { %1356 = vmax.xlane.f32.xlu1 %v1355_v43  ;;  %v1024_v45 = vpop.f32.mrb[14].mxu1 }
 0x27b   : > { %v6268_v49 = vadd.f32 %v1024_v45, %v6228_v19  ;;  %v4857_v50 = vpop.f32.mrb[15].mxu1 }
 0x27d   : > { %v1358_v54 = vsel %vm1336_vm3, %v6268_v49, -inf }
 0x27e   : > { %v1322_v56 = vpop.f32.mrb[18].mxu0  ;;  %1359 = vmax.xlane.f32.xlu1 %v1358_v54  ;;  %v1029_v58 = vpop.f32.mrb[16].mxu1 }
 0x27f   : > { %v6273_v62 = vadd.f32 %v1322_v56, %v6220_v42  ;;  %v6276_v0 = vadd.f32 %v1029_v58, %v6238_v55  ;;  %v4860_v1 = vpop.f32.mrb[17].mxu1  ;;  %v4899_v6 = vpop.f32.mrb[19].mxu0 }
 0x281   : > { %v1361_v9 = vsel %vm1336_vm3, %v6276_v0, -inf  ;;  %v1382_v10 = vsel %vm1336_vm3, %v6273_v62, -inf }
 0x282   : > { %v1327_v23 = vpop.f32.mrb[20].mxu0  ;;  %1362 = vmax.xlane.f32.xlu1 %v1361_v9  ;;  %v1120_v24 = vpop.f32.mrb[18].mxu1  ;;  %1383 = vmax.xlane.f32.xlu0 %v1382_v10 }
 0x283   : > { %v6283_v30 = vadd.f32 %v1120_v24, %v6220_v42  ;;  %v4869_v33 = vpop.f32.mrb[19].mxu1  ;;  %v4902_v34 = vpop.f32.mrb[21].mxu0  ;;  %v6286_v35 = vadd.f32 %v1327_v23, %v6228_v19 }
 0x285   : > { %v1364_v40 = vsel %vm1336_vm3, %v6283_v30, -inf  ;;  %v1385_v58 = vsel %vm1336_vm3, %v6286_v35, -inf }
 0x286   : > { %v1125_v43 = vpop.f32.mrb[20].mxu1  ;;  %v1332_v45 = vpop.f32.mrb[22].mxu0  ;;  %1365 = vmax.xlane.f32.xlu0 %v1364_v40 }
 0x287   : > { %v4872_v50 = vpop.f32.mrb[21].mxu1  ;;  %v4905_v54 = vpop.f32.mrb[23].mxu0  ;;  %v6291_v56 = vadd.f32 %v1125_v43, %v6228_v19  ;;  %v6296_v9 = vadd.f32 %v1332_v45, %v6238_v55 }
 0x289   : > { %v1367_v10 = vsel %vm1336_vm3, %v6291_v56, -inf  ;;  %v1388_v43 = vsel %vm1336_vm3, %v6296_v9, -inf }
 0x28a   : > { %v1130_v1 = vpop.f32.mrb[22].mxu1  ;;  %1386 = vmax.xlane.f32.xlu0 %v1385_v58 }
 0x28b   : > { %v4875_v6 = vpop.f32.mrb[23].mxu1  ;;  %v6304_v34 = vadd.f32 %v1130_v1, %v6238_v55 }
 0x28d   : > { %v1370_v58 = vsel %vm1336_vm3, %v6304_v34, -inf }
 0x28e   : > { %v1221_v23 = vpop.f32.mrb[24].mxu1  ;;  %1368 = vmax.xlane.f32.xlu0 %v1367_v10 }
 0x28f   : > { %v6301_v24 = vadd.f32 %v1221_v23, %v6220_v42  ;;  %v4884_v33 = vpop.f32.mrb[25].mxu1 }
 0x291   : > { %v1373_v40 = vsel %vm1336_vm3, %v6301_v24, -inf }
 0x292   : > { %1374 = vmax.xlane.f32.xlu1 %v1373_v40  ;;  %v1226_v45 = vpop.f32.mrb[26].mxu1  ;;  %1389 = vmax.xlane.f32.xlu0 %v1388_v43  ;;  %v6332_v43 = vpop.permute.xlu1 %5455 }
 0x293   : > { %v6311_v50 = vadd.f32 %v1226_v45, %v6228_v19  ;;  %v4887_v54 = vpop.f32.mrb[27].mxu1  ;;  %v6326_v19 = vpop.permute.xlu0 %5450 }
 0x295   : > { %v1376_v42 = vsel %vm1336_vm3, %v6311_v50, -inf }
 0x296   : > { %1377 = vmax.xlane.f32.xlu1 %v1376_v42  ;;  %v1231_v1 = vpop.f32.mrb[28].mxu1  ;;  %1371 = vmax.xlane.f32.xlu0 %v1370_v58  ;;  %v6336_v45 = vpop.permute.xlu1 %1845 }
 0x297   : > { %v6318_v6 = vadd.f32 %v1231_v1, %v6238_v55  ;;  %v4890_v10 = vpop.f32.mrb[29].mxu1  ;;  %v6328_v33 = vpop.permute.xlu0 %1744 }
 0x299   : > { %v1379_v23 = vsel %vm1336_vm3, %v6318_v6, -inf }
 0x29a   : > { %1380 = vmax.xlane.f32.xlu1 %v1379_v23  ;;  %v6340_v42 = vpop.permute.xlu1 %5470 }
 0x29b   : > { %v6330_v40 = vpop.permute.xlu0 %5460 }
 0x29e   : > { %v6344_v58 = vpop.permute.xlu1 %2255 }
 0x29f   : > { %v6334_v55 = vpop.permute.xlu0 %1946 }
 0x2a2   : > { %v6348_v1 = vpop.permute.xlu1 %2141 }
 0x2a3   : > { %v6338_v54 = vpop.permute.xlu0 %5465  ;;  %7254 = vst [vmem:[#allocation6_spill] sm:$0xff] %v6348_v1 }
 0x2a6   : > { %v6352_v23 = vpop.permute.xlu1 %2047 }
 0x2aa   : > { %v6355_v13 = vpop.permute.xlu1 %5485 }
 0x2ab   : > { %2245 = vrot.lane.b32.xlu1 %v5950_v27, %s5747_s18  ;;  %v6342_v27 = vpop.permute.xlu0 %2151 }
 0x2ac   : > { %2143 = vrot.lane.b32.xlu0 %v5930_v17, %s5747_s18  ;;  %7252 = vst [vmem:[#allocation4_spill] sm:$0xff] %v6342_v27 }
 0x2af   : > { %v6346_v17 = vpop.permute.xlu0 %5475 }
 0x2b0   : > { %7253 = vst [vmem:[#allocation5_spill] sm:$0xff] %v6346_v17 }
 0x2b3   : > { %v6350_v10 = vpop.permute.xlu0 %5480 }
 0x2ef   : > { %v1339_v20 = vpop.xlane.xlu0 %1338 }
 0x2f0   : > { %v1391_v21 = vsub.f32 %v6223_v44, %v1339_v20 }
 0x2f2   : > { %v1409_v15 = vmul.f32 1.442695, %v1391_v21 }
 0x2f3   : > { %v1342_v14 = vpop.xlane.xlu0 %1341 }
 0x2f4   : > { %5561 = vpow2.f32 %v1409_v15  ;;  %v1392_v26 = vsub.f32 %v6233_v53, %v1342_v14 }
 0x2f6   : > { %v1411_v18 = vmul.f32 1.442695, %v1392_v26 }
 0x2f7   : > { %v1345_v16 = vpop.xlane.xlu1 %1344 }
 0x2f8   : > { %5563 = vpow2.f32 %v1411_v18  ;;  %v1393_v2 = vsub.f32 %v6243_v61, %v1345_v16 }
 0x2fa   : > { %v1413_v11 = vmul.f32 1.442695, %v1393_v2 }
 0x2fb   : > { %v1348_v1 = vpop.xlane.xlu1 %1347 }
 0x2fc   : > { %5565 = vpow2.f32 %v1413_v11  ;;  %v1394_v27 = vsub.f32 %v6248_v5, %v1348_v1 }
 0x2fe   : > { %v6360_v17 = vpop.eup %5561  ;;  %v1415_v20 = vmul.f32 1.442695, %v1394_v27 }
 0x2ff   : > { %v1351_v21 = vpop.xlane.xlu0 %1350  ;;  %v1445_v44 = vsel %vm1336_vm3, %v6360_v17, 0.0 }
 0x300   : > { %5567 = vpow2.f32 %v1415_v20  ;;  %v1395_v14 = vsub.f32 %v6253_v22, %v1351_v21  ;;  %1446 = vadd.xlane.f32.xlu1 %v1445_v44 }
 0x302   : > { %v6365_v26 = vpop.eup %5563  ;;  %v1417_v15 = vmul.f32 1.442695, %v1395_v14 }
 0x303   : > { %v1354_v16 = vpop.xlane.xlu0 %1353  ;;  %v1448_v2 = vsel %vm1336_vm3, %v6365_v26, 0.0 }
 0x304   : > { %5569 = vpow2.f32 %v1417_v15  ;;  %v1396_v11 = vsub.f32 %v6258_v32, %v1354_v16  ;;  %1449 = vadd.xlane.f32.xlu1 %v1448_v2 }
 0x306   : > { %v6370_v18 = vpop.eup %5565  ;;  %v1419_v53 = vmul.f32 1.442695, %v1396_v11 }
 0x307   : > { %v1357_v61 = vpop.xlane.xlu1 %1356  ;;  %v1451_v5 = vsel %vm1336_vm3, %v6370_v18, 0.0 }
 0x308   : > { %5571 = vpow2.f32 %v1419_v53  ;;  %v1397_v22 = vsub.f32 %v6263_v37, %v1357_v61  ;;  %1452 = vadd.xlane.f32.xlu1 %v1451_v5 }
 0x30a   : > { %v6375_v27 = vpop.eup %5567  ;;  %v1421_v1 = vmul.f32 1.442695, %v1397_v22 }
 0x30b   : > { %v1360_v20 = vpop.xlane.xlu1 %1359  ;;  %v1454_v21 = vsel %vm1336_vm3, %v6375_v27, 0.0 }
 0x30c   : > { %5573 = vpow2.f32 %v1421_v1  ;;  %v1398_v32 = vsub.f32 %v6268_v49, %v1360_v20  ;;  %1455 = vadd.xlane.f32.xlu0 %v1454_v21 }
 0x30e   : > { %v6380_v44 = vpop.eup %5569  ;;  %v1423_v14 = vmul.f32 1.442695, %v1398_v32 }
 0x30f   : > { %v1363_v15 = vpop.xlane.xlu1 %1362  ;;  %v1384_v16 = vpop.xlane.xlu0 %1383  ;;  %v1457_v37 = vsel %vm1336_vm3, %v6380_v44, 0.0 }
 0x310   : > { %5575 = vpow2.f32 %v1423_v14  ;;  %v1399_v2 = vsub.f32 %v6276_v0, %v1363_v15  ;;  %v1406_v11 = vsub.f32 %v6273_v62, %v1384_v16  ;;  %1458 = vadd.xlane.f32.xlu0 %v1457_v37 }
 0x312   : > { %v6386_v53 = vpop.eup %5571  ;;  %v1425_v61 = vmul.f32 1.442695, %v1399_v2  ;;  %v1439_v5 = vmul.f32 1.442695, %v1406_v11 }
 0x313   : > { %v1366_v49 = vpop.xlane.xlu0 %1365  ;;  %v1460_v22 = vsel %vm1336_vm3, %v6386_v53, 0.0 }
 0x314   : > { %5577 = vpow2.f32 %v1425_v61  ;;  %v1400_v1 = vsub.f32 %v6283_v30, %v1366_v49  ;;  %1461 = vadd.xlane.f32.xlu0 %v1460_v22 }
 0x315   : > { %5579 = vpow2.f32 %v1439_v5 }
 0x316   : > { %v6391_v20 = vpop.eup %5573  ;;  %v1427_v21 = vmul.f32 1.442695, %v1400_v1 }
 0x317   : > { %v1387_v0 = vpop.xlane.xlu0 %1386  ;;  %v1463_v62 = vsel %vm1336_vm3, %v6391_v20, 0.0 }
 0x318   : > { %5581 = vpow2.f32 %v1427_v21  ;;  %v1407_v32 = vsub.f32 %v6286_v35, %v1387_v0  ;;  %1464 = vadd.xlane.f32.xlu1 %v1463_v62 }
 0x31a   : > { %v6396_v14 = vpop.eup %5575  ;;  %v1441_v15 = vmul.f32 1.442695, %v1407_v32 }
 0x31b   : > { %v1369_v16 = vpop.xlane.xlu0 %1368  ;;  %v1466_v30 = vsel %vm1336_vm3, %v6396_v14, 0.0 }
 0x31c   : > { %5583 = vpow2.f32 %v1441_v15  ;;  %v1401_v37 = vsub.f32 %v6291_v56, %v1369_v16  ;;  %1467 = vadd.xlane.f32.xlu1 %v1466_v30 }
 0x31e   : > { %v6401_v2 = vpop.eup %5577  ;;  %v1429_v11 = vmul.f32 1.442695, %v1401_v37 }
 0x31f   : > { %v1390_v61 = vpop.xlane.xlu0 %1389  ;;  %v1469_v5 = vsel %vm1336_vm3, %v6401_v2, 0.0  ;;  %v6405_v35 = vpop.eup %5579 }
 0x320   : > { %5585 = vpow2.f32 %v1429_v11  ;;  %v1408_v49 = vsub.f32 %v6296_v9, %v1390_v61  ;;  %1470 = vadd.xlane.f32.xlu1 %v1469_v5  ;;  %v1490_v56 = vsel %vm1336_vm3, %v6405_v35, 0.0  ;;  %v1375_v5 = vpop.xlane.xlu1 %1374 }
 0x322   : > { %v6408_v22 = vpop.eup %5581  ;;  %v1443_v1 = vmul.f32 1.442695, %v1408_v49 }
 0x323   : > { %v1372_v21 = vpop.xlane.xlu0 %1371  ;;  %v1472_v0 = vsel %vm1336_vm3, %v6408_v22, 0.0 }
 0x324   : > { %v1402_v62 = vsub.f32 %v6304_v34, %v1372_v21  ;;  %1491 = vadd.xlane.f32.xlu1 %v1490_v56  ;;  %1473 = vadd.xlane.f32.xlu0 %v1472_v0  ;;  %5587 = vpow2.f32 %v1443_v1  ;;  %v1378_v49 = vpop.xlane.xlu1 %1377  ;;  %v1403_v1 = vsub.f32 %v6301_v24, %v1375_v5 }
 0x325   : > { %v1404_v56 = vsub.f32 %v6311_v50, %v1378_v49  ;;  %v7257_v49 = vmov 0.0  }
 0x326   : > { %v6415_v32 = vpop.eup %5583  ;;  %v1431_v15 = vmul.f32 1.442695, %v1402_v62  ;;  %v1433_v21 = vmul.f32 1.442695, %v1403_v1 }
 0x327   : > { %v1493_v9 = vsel %vm1336_vm3, %v6415_v32, 0.0  ;;  %v1435_v62 = vmul.f32 1.442695, %v1404_v56  ;;  %v5458_v56 = vunpack.i.h.bf16 %v6332_v43 }
 0x328   : > { %1494 = vadd.xlane.f32.xlu1 %v1493_v9  ;;  %5589 = vpow2.f32 %v1431_v15  ;;  %v1381_v0 = vpop.xlane.xlu1 %1380  ;;  %v7255_v9 = vmax.f32 %v5978_v41, 0.0 }
 0x329   : > { %5591 = vpow2.f32 %v1433_v21  ;;  %v7258_v21 = vmov 0.0|0.0  }
 0x32a   : > { %v6419_v16 = vpop.eup %5585  ;;  %5593 = vpow2.f32 %v1435_v62 }
 0x32b   : > { %v1475_v30 = vsel %vm1336_vm3, %v6419_v16, 0.0 }
 0x32c   : > { %1476 = vadd.xlane.f32.xlu0 %v1475_v30 }
 0x32e   : > { %v6423_v37 = vpop.eup %5587 }
 0x32f   : > { %v1496_v34 = vsel %vm1336_vm3, %v6423_v37, 0.0 }
 0x330   : > { %1497 = vadd.xlane.f32.xlu1 %v1496_v34 }
 0x332   : > { %v6427_v11 = vpop.eup %5589 }
 0x333   : > { %v1478_v61 = vsel %vm1336_vm3, %v6427_v11, 0.0  ;;  %v6448_v24 = vpop.eup %5591 }
 0x334   : > { %1479 = vadd.xlane.f32.xlu1 %v1478_v61  ;;  %v6454_v50 = vpop.eup %5593 }
 0x342   : > { %2145 = vrot.lane.b32.xlu0 %v5953_v28, %s5747_s18 }
 0x345   : > { %2247 = vrot.lane.b32.xlu1 %v5956_v31, %s5747_s18  ;;  %v1405_v31 = vsub.f32 %v6318_v6, %v1381_v0 }
 0x347   : > { %v1437_v15 = vmul.f32 1.442695, %v1405_v31  ;;  %v7259_v31 = vmax.f32 %v5953_v28, 0.0 }
 0x349   : > { %2249 = vrot.lane.b32.xlu1 %v5978_v41, %s5747_s18  ;;  %5595 = vpow2.f32 %v1437_v15 }
 0x34d   : > { %2463 = vrot.lane.b32.xlu1 %v6003_v52, %s5746_s17 }
 0x351   : > { %2349 = vrot.lane.b32.xlu1 %v5970_v38, %s5747_s18  ;;  %v1481_v38 = vsel %vm1336_vm3, %v6448_v24, 0.0 }
 0x353   : > { %v6460_v6 = vpop.eup %5595 }
 0x355   : > { %2453 = vrot.lane.b32.xlu1 %v5992_v47, %s5747_s18  ;;  %v1484_v47 = vsel %vm1336_vm3, %v6454_v50, 0.0 }
 0x359   : > { %2455 = vrot.lane.b32.xlu1 %v5998_v51, %s5747_s18  ;;  %v1487_v51 = vsel %vm1336_vm3, %v6460_v6, 0.0 }
 0x35d   : > { %2457 = vrot.lane.b32.xlu1 %v6003_v52, %s5747_s18 }
 0x361   : > { %1482 = vadd.xlane.f32.xlu0 %v1481_v38  ;;  %2671 = vrot.lane.b32.xlu1 %v6054_v12, %s5746_s17 }
 0x365   : > { %1485 = vadd.xlane.f32.xlu0 %v1484_v47  ;;  %2661 = vrot.lane.b32.xlu1 %v6031_v3, %s5747_s18  ;;  %v7256_v3 = vmax.f32 %v6003_v52, 0.0  ;;  %v5463_v47 = vunpack.i.h.bf16 %v6330_v40 }
 0x369   : > { %1488 = vadd.xlane.f32.xlu0 %v1487_v51  ;;  %2663 = vrot.lane.b32.xlu1 %v6037_v7, %s5747_s18  ;;  %v5453_v7 = vunpack.i.h.bf16 %v6326_v19 }
 0x36d   : > { %2665 = vrot.lane.b32.xlu1 %v6054_v12, %s5747_s18 }
 0x371   : > { %5505 = vrot.lane.b32.xlu1 %v5974_v39, %s5748_s28  ;;  %v6486_v39 = vpop.permute.xlu1 %2245 }
 0x375   : > { %3065 = vrot.lane.b32.xlu1 %v7255_v9, %s5748_s28 }
 0x379   : > { %5515 = vrot.lane.b32.xlu1 %v6018_v60, %s5748_s28  ;;  %v6494_v60 = vpop.permute.xlu0 %2143 }
 0x37d   : > { %3261 = vrot.lane.b32.xlu1 %v7256_v3, %s5748_s28 }
 0x37f   : > { %2359 = vrot.lane.b32.xlu0 %v5995_v48, %s5746_s17 }
 0x383   : > { %5490 = vrot.lane.b32.xlu0 %v6023_v63, %s5746_s17 }
 0x387   : > { %5495 = vrot.lane.b32.xlu0 %v6043_v8, %s5746_s17  ;;  %v5452_v8 = vunpack.i.l.bf16 %v6326_v19 }
 0x389   : > { %v5310_v61 = vpack.c.bf16 %v5453_v7, %v5452_v8  ;;  %v5488_v7 = vunpack.i.h.bf16 %v6355_v13  ;;  %v5487_v8 = vunpack.i.l.bf16 %v6355_v13 }
 0x38b   : > { %2351 = vrot.lane.b32.xlu0 %v5967_v36, %s5747_s18 }
 0x38d   : > { %v1447_v41 = vpop.xlane.xlu1 %1446 }
 0x38e   : > { %5597 = vrcp.f32 %v1447_v41 }
 0x38f   : > { %2353 = vrot.lane.b32.xlu0 %v5995_v48, %s5747_s18 }
 0x391   : > { %v1450_v52 = vpop.xlane.xlu1 %1449 }
 0x392   : > { %5599 = vrcp.f32 %v1450_v52 }
 0x393   : > { %2567 = vrot.lane.b32.xlu0 %v6034_v4, %s5746_s17  ;;  %s5389_s17 = smul.u32 48, %s7269_s22 }
 0x395   : > { %v1453_v63 = vpop.xlane.xlu1 %1452  ;;  %s7197_s23 = scalar_lea.vmem %s7234_s12, %s5389_s17 }
 0x396   : > { %5601 = vrcp.f32 %v1453_v63 }
 0x397   : > { %2557 = vrot.lane.b32.xlu0 %v6013_v59, %s5747_s18 }
 0x398   : > { %v5598_v36 = vpop.eup %5597 }
 0x399   : > { %v1517_v30 = vmul.f32 %v5598_v36, %v6360_v17  ;;  %v1456_v34 = vpop.xlane.xlu0 %1455 }
 0x39a   : > { %5603 = vrcp.f32 %v1456_v34 }
 0x39b   : > { %2559 = vrot.lane.b32.xlu0 %v6010_v57, %s5747_s18  ;;  %4913 = vmatmul.mubr.msk.f32.vlgmr.msra.gmra.mrb[30].mxu1 %vm1336_vm3, %v1517_v30  ;;  %v5319_v30 = vpack.c.bf16 %v5488_v7, %v5487_v8  ;;  %v7263_v8 = vld [vmem:[#allocation6_spill] sm:$0xff] }
 0x39c   : > { %v5600_v5 = vpop.eup %5599  ;;  %5311 = vmatpush3.bf16.msra.mxu1 %v5310_v61  ;;  %4915 = vmatprep.mubr.msk.f32.mxu1 %vm5743_vm0, %v7257_v49 }
 0x39d   : > { %v1459_v19 = vpop.xlane.xlu0 %1458  ;;  %4940 = vmatprep.subr.mxu1 %v7257_v49  ;;  %v1518_v59 = vmul.f32 %v5600_v5, %v6365_v26  ;;  %v5457_v26 = vunpack.i.l.bf16 %v6332_v43 }
 0x39e   : > { %5605 = vrcp.f32 %v1459_v19 }
 0x39f   : > { %2561 = vrot.lane.b32.xlu0 %v6034_v4, %s5747_s18  ;;  %4916 = vmatmul.mubr.msk.f32.gmra.mrb[32].mxu1 %vm1336_vm3, %v1518_v59 }
 0x3a0   : > { %v5602_v17 = vpop.eup %5601  ;;  %4941 = vmatpush3.msra.mxu1 %v6328_v33  ;;  %4918 = vmatprep.mubr.msk.f32.mxu1 %vm5743_vm0, %v7257_v49 }
 0x3a1   : > { %v1462_v57 = vpop.xlane.xlu0 %1461  ;;  %v1519_v1 = vmul.f32 %v5602_v17, %v6370_v18  ;;  %5315 = vmatprep.subr.bf16.mxu1 %v7258_v21  ;;  %v5313_v18 = vpack.c.bf16 %v5458_v56, %v5457_v26  ;;  %v5473_v17 = vunpack.i.h.bf16 %v6340_v42 }
 0x3a2   : > { %5607 = vrcp.f32 %v1462_v57 }
 0x3a3   : > { %5500 = vrot.lane.b32.xlu0 %v5943_v25, %s5748_s28  ;;  %4919 = vmatmul.mubr.msk.f32.gmra.mrb[34].mxu1 %vm1336_vm3, %v1519_v1 }
 0x3a4   : > { %v5604_v0 = vpop.eup %5603  ;;  %4942 = vmatprep.mubr.msk.f32.mxu1 %vm5743_vm0, %v7257_v49 }
 0x3a5   : > { %v1520_v33 = vmul.f32 %v5604_v0, %v6375_v27  ;;  %v1465_v62 = vpop.xlane.xlu1 %1464  ;;  %v5483_v0 = vunpack.i.h.bf16 %v6350_v10 }
 0x3a6   : > { %5609 = vrcp.f32 %v1465_v62 }
 0x3a7   : > { %2967 = vrot.lane.b32.xlu0 %v7259_v31, %s5748_s28  ;;  %4928 = vmatmul.mubr.msk.f32.vlgmr.msra.gmra.mrb[24].mxu0 %vm1336_vm3, %v1520_v33  ;;  %v5482_v33 = vunpack.i.l.bf16 %v6350_v10 }
 0x3a8   : > { %v5606_v43 = vpop.eup %5605  ;;  %5314 = vmatpush3.bf16.msra.mxu0 %v5313_v18  ;;  %4930 = vmatprep.mubr.msk.f32.mxu0 %vm5743_vm0, %v7257_v49 }
 0x3a9   : > { %v1468_v25 = vpop.xlane.xlu1 %1467  ;;  %4955 = vmatprep.subr.mxu0 %v7257_v49  ;;  %v1521_v15 = vmul.f32 %v5606_v43, %v6380_v44  ;;  %v5462_v44 = vunpack.i.l.bf16 %v6330_v40 }
 0x3aa   : > { %5611 = vrcp.f32 %v1468_v25  ;;  %v5468_v25 = vunpack.i.h.bf16 %v6338_v54 }
 0x3ab   : > { %5510 = vrot.lane.b32.xlu0 %v5989_v46, %s5748_s28  ;;  %4931 = vmatmul.mubr.msk.f32.gmra.mrb[26].mxu0 %vm1336_vm3, %v1521_v15  ;;  %v7260_v46 = vmax.f32 %v5995_v48, 0.0  ;;  %v5316_v9 = vpack.c.bf16 %v5463_v47, %v5462_v44  ;;  %v5467_v15 = vunpack.i.l.bf16 %v6338_v54 }
 0x3ac   : > { %v5608_v28 = vpop.eup %5607  ;;  %4956 = vmatpush3.msra.mxu0 %v6336_v45  ;;  %4933 = vmatprep.mubr.msk.f32.mxu0 %vm5743_vm0, %v7257_v49 }
 0x3ad   : > { %v1471_v27 = vpop.xlane.xlu1 %1470  ;;  %v1522_v38 = vmul.f32 %v5608_v28, %v6386_v53  ;;  %5318 = vmatprep.subr.bf16.mxu0 %v7258_v21  ;;  %v5322_v44 = vpack.c.bf16 %v5468_v25, %v5467_v15 }
 0x3ae   : > { %5613 = vrcp.f32 %v1471_v27 }
 0x3af   : > { %3163 = vrot.lane.b32.xlu0 %v7260_v46, %s5748_s28  ;;  %4934 = vmatmul.mubr.msk.f32.gmra.mrb[28].mxu0 %vm1336_vm3, %v1522_v38 }
 0x3b0   : > { %v5610_v45 = vpop.eup %5609  ;;  %4957 = vmatprep.mubr.msk.f32.mxu0 %vm5743_vm0, %v7257_v49 }
 0x3b1   : > { %v1523_v51 = vmul.f32 %v5610_v45, %v6391_v20  ;;  %v1474_v53 = vpop.xlane.xlu0 %1473  ;;  %v1492_v40 = vpop.xlane.xlu1 %1491 }
 0x3b2   : > { %5615 = vrcp.f32 %v1474_v53 }
 0x3b3   : > { %4943 = vmatmul.mubr.msk.f32.vlgmr.msra.gmra.mrb[36].mxu1 %vm1336_vm3, %v1523_v51 }
 0x3b4   : > { %v5612_v3 = vpop.eup %5611  ;;  %5317 = vmatpush3.bf16.msra.mxu1 %v5316_v9  ;;  %4945 = vmatprep.mubr.msk.f32.mxu1 %vm5743_vm0, %v7257_v49 }
 0x3b5   : > { %4970 = vmatprep.subr.mxu1 %v7257_v49  ;;  %v1524_v48 = vmul.f32 %v5612_v3, %v6396_v14  ;;  %v1495_v63 = vpop.xlane.xlu1 %1494  ;;  %v7261_v3 = vld [vmem:[#allocation5_spill] sm:$0xff] }
 0x3b7   : > { %4946 = vmatmul.mubr.msk.f32.gmra.mrb[38].mxu1 %vm1336_vm3, %v1524_v48  ;;  %v5477_v48 = vunpack.i.l.bf16 %v7261_v3 }
 0x3b8   : > { %v5614_v41 = vpop.eup %5613  ;;  %4971 = vmatpush3.msra.mxu1 %v6334_v55  ;;  %4948 = vmatprep.mubr.msk.f32.mxu1 %vm5743_vm0, %v7257_v49 }
 0x3b9   : > { %v1477_v20 = vpop.xlane.xlu0 %1476  ;;  %v1525_v52 = vmul.f32 %v5614_v41, %v6401_v2  ;;  %5321 = vmatprep.subr.bf16.mxu1 %v7258_v21 }
 0x3ba   : > { %5617 = vrcp.f32 %v1477_v20 }
 0x3bb   : > { %4949 = vmatmul.mubr.msk.f32.gmra.mrb[40].mxu1 %vm1336_vm3, %v1525_v52 }
 0x3bc   : > { %4972 = vmatprep.mubr.msk.f32.mxu1 %vm5743_vm0, %v7257_v49  ;;  %v5616_v55 = vpop.eup %5615 }
 0x3bd   : > { %v1526_v14 = vmul.f32 %v5616_v55, %v6408_v22  ;;  %v1498_v36 = vpop.xlane.xlu1 %1497  ;;  %v6618_v10 = vpop.permute.xlu0 %2145 }
 0x3bf   : > { %4958 = vmatmul.mubr.msk.f32.vlgmr.msra.gmra.mrb[30].mxu0 %vm1336_vm3, %v1526_v14 }
 0x3c0   : > { %5320 = vmatpush3.bf16.msra.mxu0 %v5319_v30  ;;  %4960 = vmatprep.mubr.msk.f32.mxu0 %vm5743_vm0, %v7257_v49 }
 0x3c1   : > { %v1480_v2 = vpop.xlane.xlu1 %1479  ;;  %4985 = vmatprep.subr.mxu0 %v7257_v49 }
 0x3c2   : > { %5619 = vrcp.f32 %v1480_v2 }
 0x3c3   : > { %5621 = vrcp.f32 %v1492_v40  ;;  %v5478_v40 = vunpack.i.h.bf16 %v7261_v3  ;;  %v6744_v3 = vld [vmem:[%s7225_s3] sm:$0xff] }
 0x3c4   : > { %v5618_v13 = vpop.eup %5617  ;;  %4986 = vmatpush3.msra.mxu0 %v6352_v23  ;;  %5623 = vrcp.f32 %v1495_v63  ;;  %v5472_v23 = vunpack.i.l.bf16 %v6340_v42  ;;  %v7262_v63 = vld [vmem:[#allocation4_spill] sm:$0xff] }
 0x3c5   : > { %v1527_v34 = vmul.f32 %v5618_v13, %v6419_v16  ;;  %5325 = vmatprep.subr.bf16.mxu0 %v7258_v21  ;;  %v2248_v22 = vpop.permute.xlu1 %2247  ;;  %5625 = vrcp.f32 %v1498_v36 }
 0x3c6   : > { %v5326_v1 = vpack.c.bf16 %v5473_v17, %v5472_v23 }
 0x3c7   : > { %4961 = vmatmul.mubr.msk.f32.gmra.mrb[32].mxu0 %vm1336_vm3, %v1527_v34 }
 0x3c8   : > { %4963 = vmatprep.mubr.msk.f32.mxu0 %vm5743_vm0, %v7257_v49 }
 0x3c9   : > { %v2250_v5 = vpop.permute.xlu1 %2249 }
 0x3cc   : > { %v5620_v61 = vpop.eup %5619 }
 0x3cd   : > { %v1528_v19 = vmul.f32 %v5620_v61, %v6427_v11  ;;  %v5622_v59 = vpop.eup %5621  ;;  %v2464_v56 = vpop.permute.xlu1 %2463 }
 0x3ce   : > { %v1532_v16 = vmul.f32 %v5622_v59, %v6405_v35  ;;  %v5624_v57 = vpop.eup %5623 }
 0x3cf   : > { %4964 = vmatmul.mubr.msk.f32.gmra.mrb[34].mxu0 %vm1336_vm3, %v1528_v19  ;;  %v1533_v42 = vmul.f32 %v5624_v57, %v6415_v32  ;;  %v5626_v11 = vpop.eup %5625  ;;  %v5334_v32 = vpack.c.bf16 %v5483_v0, %v5482_v33 }
 0x3d0   : > { %4987 = vmatprep.mubr.msk.f32.mxu0 %vm5743_vm0, %v7257_v49  ;;  %v1534_v26 = vmul.f32 %v5626_v11, %v6423_v37 }
 0x3d1   : > { %v6593_v35 = vpop.permute.xlu1 %2349 }
 0x3d3   : > { %4988 = vmatmul.mubr.msk.f32.vlgmr.msra.gmra.mrb[36].mxu0 %vm1336_vm3, %v1532_v16 }
 0x3d4   : > { %5328 = vmatpush3.bf16.xpose.msk.msra.mxu0 %vm6107_vm2, %v5326_v1  ;;  %4990 = vmatprep.mubr.msk.f32.mxu0 %vm5743_vm0, %v7257_v49 }
 0x3d5   : > { %5015 = vmatprep.subr.mxu0 %v7257_v49  ;;  %v2454_v62 = vpop.permute.xlu1 %2453 }
 0x3d7   : > { %4991 = vmatmul.mubr.msk.f32.gmra.mrb[38].mxu0 %vm1336_vm3, %v1533_v42 }
 0x3d8   : > { %4993 = vmatprep.mubr.msk.f32.mxu0 %vm5743_vm0, %v7257_v49 }
 0x3db   : > { %4994 = vmatmul.mubr.msk.f32.gmra.mrb[40].mxu0 %vm1336_vm3, %v1534_v26 }
 0x3dc   : > { %5016 = vmatpush3.xpose.msk.msra.mxu0 %vm738_vm1, %v6344_v58  ;;  %5017 = vmatprep.mubr.msk.f32.mxu0 %vm5743_vm0, %v7257_v49  ;;  %v2456_v58 = vpop.permute.xlu1 %2455 }
 0x3dd   : > { %5333 = vmatprep.subr.bf16.mxu0 %v7258_v21 }
 0x3df   : > { %5018 = vmatmul.mubr.msk.f32.vlgmr.msra.gmra.mrb[42].mxu0 %vm738_vm1, %v6486_v39 }
 0x3e0   : > { %5336 = vmatpush3.bf16.xpose.msk.msra.mxu0 %vm6107_vm2, %v5334_v32  ;;  %5020 = vmatprep.mubr.msk.f32.mxu0 %vm5743_vm0, %v7257_v49  ;;  %v2458_v37 = vpop.permute.xlu1 %2457 }
 0x3e1   : > { %5045 = vmatprep.subr.mxu0 %v7257_v49 }
 0x3e3   : > { %5021 = vmatmul.mubr.msk.f32.gmra.mrb[44].mxu0 %vm738_vm1, %v2248_v22 }
 0x3e4   : > { %5023 = vmatprep.mubr.msk.f32.mxu0 %vm5743_vm0, %v7257_v49  ;;  %v2672_v18 = vpop.permute.xlu1 %2671 }
 0x3e7   : > { %5024 = vmatmul.mubr.msk.f32.gmra.mrb[46].mxu0 %vm738_vm1, %v2250_v5 }
 0x3e8   : > { %5046 = vmatpush3.xpose.msk.msra.mxu0 %vm738_vm1, %v2464_v56  ;;  %5047 = vmatprep.mubr.msk.f32.mxu0 %vm5743_vm0, %v7257_v49  ;;  %v2662_v28 = vpop.permute.xlu1 %2661 }
 0x3e9   : > { %5341 = vmatprep.subr.bf16.mxu0 %v7258_v21 }
 0x3eb   : > { %5048 = vmatmul.mubr.msk.f32.vlgmr.msra.gmra.mrb[48].mxu0 %vm738_vm1, %v2454_v62 }
 0x3ec   : > { %5050 = vmatprep.mubr.msk.f32.mxu0 %vm5743_vm0, %v7257_v49  ;;  %v2664_v45 = vpop.permute.xlu1 %2663 }
 0x3ee   : > { %v1483_v39 = vpop.xlane.xlu0 %1482 }
 0x3ef   : > { %5627 = vrcp.f32 %v1483_v39  ;;  %5051 = vmatmul.mubr.msk.f32.gmra.mrb[50].mxu0 %vm738_vm1, %v2456_v58 }
 0x3f0   : > { %5053 = vmatprep.mubr.msk.f32.mxu0 %vm5743_vm0, %v7257_v49  ;;  %v2666_v52 = vpop.permute.xlu1 %2665 }
 0x3f2   : > { %v1486_v31 = vpop.xlane.xlu0 %1485 }
 0x3f3   : > { %5629 = vrcp.f32 %v1486_v31  ;;  %5054 = vmatmul.mubr.msk.f32.gmra.mrb[52].mxu0 %vm738_vm1, %v2458_v37 }
 0x3f4   : > { %5077 = vmatprep.mubr.msk.f32.mxu0 %vm5743_vm0, %v7257_v49  ;;  %v5506_v55 = vpop.permute.xlu1 %5505 }
 0x3f5   : > { %v5508_v36 = vunpack.i.h.bf16 %v5506_v55  ;;  %v5507_v30 = vunpack.i.l.bf16 %v5506_v55 }
 0x3f6   : > { %v1489_v43 = vpop.xlane.xlu0 %1488 }
 0x3f7   : > { %5631 = vrcp.f32 %v1489_v43  ;;  %v5349_v22 = vpack.c.bf16 %v5508_v36, %v5507_v30 }
 0x3f8   : > { %v3066_v5 = vpop.permute.xlu1 %3065 }
 0x3f9   : > { %v5628_v27 = vpop.eup %5627 }
 0x3fa   : > { %v1529_v38 = vmul.f32 %v5628_v27, %v6448_v24  ;;  %v2360_v47 = vpop.permute.xlu0 %2359 }
 0x3fc   : > { %4973 = vmatmul.mubr.msk.f32.vlgmr.msra.gmra.mrb[42].mxu1 %vm1336_vm3, %v1529_v38 }
 0x3fd   : > { %v5630_v46 = vpop.eup %5629  ;;  %5324 = vmatpush3.bf16.xpose.msk.msra.mxu1 %vm6107_vm2, %v5322_v44  ;;  %4975 = vmatprep.mubr.msk.f32.mxu1 %vm5743_vm0, %v7257_v49 }
 0x3fe   : > { %v5491_v51 = vpop.permute.xlu0 %5490  ;;  %v1530_v54 = vmul.f32 %v5630_v46, %v6454_v50  ;;  %5000 = vmatprep.subr.mxu1 %v7257_v49 }
 0x3ff   : > { %v5493_v13 = vunpack.i.h.bf16 %v5491_v51  ;;  %v5492_v34 = vunpack.i.l.bf16 %v5491_v51 }
 0x400   : > { %4976 = vmatmul.mubr.msk.f32.gmra.mrb[44].mxu1 %vm1336_vm3, %v1530_v54 }
 0x401   : > { %v5632_v24 = vpop.eup %5631  ;;  %4978 = vmatprep.mubr.msk.f32.mxu1 %vm5743_vm0, %v7257_v49  ;;  %v5338_v61 = vpack.c.bf16 %v5493_v13, %v5492_v34 }
 0x402   : > { %v5496_v53 = vpop.permute.xlu0 %5495  ;;  %v1531_v9 = vmul.f32 %v5632_v24, %v6460_v6  ;;  %v5330_v6 = vpack.c.bf16 %v5478_v40, %v5477_v48 }
 0x403   : > { %v5498_v41 = vunpack.i.h.bf16 %v5496_v53  ;;  %v5497_v20 = vunpack.i.l.bf16 %v5496_v53 }
 0x404   : > { %4979 = vmatmul.mubr.msk.f32.gmra.mrb[46].mxu1 %vm1336_vm3, %v1531_v9 }
 0x405   : > { %v5342_v50 = vpack.c.bf16 %v5498_v41, %v5497_v20  ;;  %5001 = vmatpush3.xpose.msk.msra.mxu1 %vm738_vm1, %v7262_v63  ;;  %5002 = vmatprep.mubr.msk.f32.mxu1 %vm5743_vm0, %v7257_v49 }
 0x406   : > { %v2352_v7 = vpop.permute.xlu0 %2351  ;;  %5329 = vmatprep.subr.bf16.mxu1 %v7258_v21 }
 0x407   : > { %5344 = vmatpush3.bf16.xpose.msk.msra.mxu0 %vm6107_vm2, %v5342_v50 }
 0x408   : > { %5003 = vmatmul.mubr.msk.f32.vlgmr.msra.gmra.mrb[48].mxu1 %vm738_vm1, %v7263_v8  ;;  %5075 = vmatprep.subr.mxu0 %v7257_v49 }
 0x409   : > { %5332 = vmatpush3.bf16.xpose.msk.msra.mxu1 %vm6107_vm2, %v5330_v6  ;;  %5005 = vmatprep.mubr.msk.f32.mxu1 %vm5743_vm0, %v7257_v49 }
 0x40a   : > { %v2354_v14 = vpop.permute.xlu0 %2353  ;;  %5030 = vmatprep.subr.mxu1 %v7257_v49 }
 0x40c   : > { %5006 = vmatmul.mubr.msk.f32.gmra.mrb[50].mxu1 %vm738_vm1, %v6494_v60 }
 0x40d   : > { %5008 = vmatprep.mubr.msk.f32.mxu1 %vm5743_vm0, %v7257_v49 }
 0x40e   : > { %v2568_v2 = vpop.permute.xlu0 %2567 }
 0x40f   : > { %5076 = vmatpush3.xpose.msk.msra.mxu0 %vm738_vm1, %v2672_v18 }
 0x410   : > { %5009 = vmatmul.mubr.msk.f32.gmra.mrb[52].mxu1 %vm738_vm1, %v6618_v10  ;;  %5348 = vmatprep.subr.bf16.mxu0 %v7258_v21 }
 0x411   : > { %5031 = vmatpush3.xpose.msk.msra.mxu1 %vm738_vm1, %v2360_v47  ;;  %5032 = vmatprep.mubr.msk.f32.mxu1 %vm5743_vm0, %v7257_v49 }
 0x412   : > { %v2558_v60 = vpop.permute.xlu0 %2557  ;;  %5078 = vmatmul.mubr.msk.f32.vlgmr.msra.gmra.mrb[54].mxu0 %vm738_vm1, %v2662_v28  ;;  %5337 = vmatprep.subr.bf16.mxu1 %v7258_v21 }
 0x413   : > { %5350 = vmatpush3.bf16.msra.mxu0 %v5349_v22  ;;  %5080 = vmatprep.mubr.msk.f32.mxu0 %vm5743_vm0, %v7257_v49 }
 0x414   : > { %5033 = vmatmul.mubr.msk.f32.vlgmr.msra.gmra.mrb[54].mxu1 %vm738_vm1, %v6593_v35  ;;  %5105 = vmatprep.subr.mxu0 %v7257_v49 }
 0x415   : > { %5340 = vmatpush3.bf16.xpose.msk.msra.mxu1 %vm6107_vm2, %v5338_v61  ;;  %5035 = vmatprep.mubr.msk.f32.mxu1 %vm5743_vm0, %v7257_v49 }
 0x416   : > { %v2560_v19 = vpop.permute.xlu0 %2559  ;;  %5081 = vmatmul.mubr.msk.f32.gmra.mrb[56].mxu0 %vm738_vm1, %v2664_v45  ;;  %5060 = vmatprep.subr.mxu1 %v7257_v49 }
 0x417   : > { %5106 = vmatpush3.msra.mxu0 %v3066_v5  ;;  %5083 = vmatprep.mubr.msk.f32.mxu0 %vm5743_vm0, %v7257_v49 }
 0x418   : > { %5036 = vmatmul.mubr.msk.f32.gmra.mrb[56].mxu1 %vm738_vm1, %v2352_v7  ;;  %5354 = vmatprep.subr.bf16.mxu0 %v7258_v21 }
 0x419   : > { %5038 = vmatprep.mubr.msk.f32.mxu1 %vm5743_vm0, %v7257_v49 }
 0x41a   : > { %v2562_v29 = vpop.permute.xlu0 %2561  ;;  %5084 = vmatmul.mubr.msk.f32.gmra.mrb[58].mxu0 %vm738_vm1, %v2666_v52 }
 0x41b   : > { %5107 = vmatprep.mubr.msk.f32.mxu0 %vm5743_vm0, %v7257_v49 }
 0x41c   : > { %5039 = vmatmul.mubr.msk.f32.gmra.mrb[58].mxu1 %vm738_vm1, %v2354_v14 }
 0x41d   : > { %5061 = vmatpush3.xpose.msk.msra.mxu1 %vm738_vm1, %v2568_v2  ;;  %5062 = vmatprep.mubr.msk.f32.mxu1 %vm5743_vm0, %v7257_v49 }
 0x41e   : > { %v5501_v59 = vpop.permute.xlu0 %5500  ;;  %5345 = vmatprep.subr.bf16.mxu1 %v7258_v21 }
 0x41f   : > { %v5503_v17 = vunpack.i.h.bf16 %v5501_v59  ;;  %v5502_v23 = vunpack.i.l.bf16 %v5501_v59 }
 0x420   : > { %5063 = vmatmul.mubr.msk.f32.vlgmr.msra.gmra.mrb[60].mxu1 %vm738_vm1, %v2558_v60 }
 0x421   : > { %v5346_v16 = vpack.c.bf16 %v5503_v17, %v5502_v23  ;;  %5065 = vmatprep.mubr.msk.f32.mxu1 %vm5743_vm0, %v7257_v49  ;;  %v5730_v17 = vld [vmem:[%s7225_s3 + $0x8] sm:$0xff] }
 0x422   : > { %v2968_v57 = vpop.permute.xlu0 %2967 }
 0x423   : > { %5347 = vmatpush3.bf16.msra.mxu1 %v5346_v16 }
 0x424   : > { %5066 = vmatmul.mubr.msk.f32.gmra.mrb[62].mxu1 %vm738_vm1, %v2560_v19  ;;  %5090 = vmatprep.subr.mxu1 %v7257_v49 }
 0x425   : > { %5068 = vmatprep.mubr.msk.f32.mxu1 %vm5743_vm0, %v7257_v49 }
 0x427   : > { %5091 = vmatpush3.msra.mxu1 %v2968_v57 }
 0x428   : > { %5069 = vmatmul.mubr.msk.f32.gmra.mrb[64].mxu1 %vm738_vm1, %v2562_v29  ;;  %5351 = vmatprep.subr.bf16.mxu1 %v7258_v21 }
 0x429   : > { %5092 = vmatprep.mubr.msk.f32.mxu1 %vm5743_vm0, %v7257_v49 }
 0x46e   : > { %v6711_v1 = vpop.f32.mrb[30].mxu1 }
 0x46f   : > { %v4914_v56 = vpop.f32.mrb[31].mxu1 }
 0x472   : > { %v6713_v42 = vpop.f32.mrb[32].mxu1 }
 0x473   : > { %v4917_v11 = vpop.f32.mrb[33].mxu1 }
 0x476   : > { %v6715_v35 = vpop.f32.mrb[34].mxu1 }
 0x477   : > { %v4920_v26 = vpop.f32.mrb[35].mxu1 }
 0x478   : > { %v5731_v26 = vld [vmem:[%s7225_s3 + $0x10] sm:$0xff] }
 0x47a   : > { %v6717_v0 = vpop.f32.mrb[24].mxu0 }
 0x47b   : > { %v4929_v33 = vpop.f32.mrb[25].mxu0 }
 0x47e   : > { %v6719_v32 = vpop.f32.mrb[26].mxu0 }
 0x47f   : > { %v4932_v62 = vpop.f32.mrb[27].mxu0 }
 0x482   : > { %v6721_v58 = vpop.f32.mrb[28].mxu0 }
 0x483   : > { %v4935_v10 = vpop.f32.mrb[29].mxu0 }
 0x486   : > { %v6723_v37 = vpop.f32.mrb[36].mxu1 }
 0x487   : > { %v4944_v39 = vpop.f32.mrb[37].mxu1 }
 0x48a   : > { %v6725_v18 = vpop.f32.mrb[38].mxu1 }
 0x48b   : > { %v4947_v31 = vpop.f32.mrb[39].mxu1 }
 0x48e   : > { %v6727_v43 = vpop.f32.mrb[40].mxu1 }
 0x48f   : > { %v4950_v25 = vpop.f32.mrb[41].mxu1 }
 0x492   : > { %v6729_v15 = vpop.f32.mrb[30].mxu0 }
 0x493   : > { %v4959_v28 = vpop.f32.mrb[31].mxu0 }
 0x49a   : > { %v6731_v27 = vpop.f32.mrb[32].mxu0 }
 0x49b   : > { %v4962_v38 = vpop.f32.mrb[33].mxu0 }
 0x4a2   : > { %v6733_v47 = vpop.f32.mrb[34].mxu0 }
 0x4a3   : > { %v4965_v44 = vpop.f32.mrb[35].mxu0 }
 0x4a6   : > { %v6735_v46 = vpop.f32.mrb[36].mxu0 }
 0x4a7   : > { %v4989_v45 = vpop.f32.mrb[37].mxu0 }
 0x4aa   : > { %v6737_v51 = vpop.f32.mrb[38].mxu0 }
 0x4ab   : > { %v4992_v54 = vpop.f32.mrb[39].mxu0 }
 0x4ae   : > { %v6739_v24 = vpop.f32.mrb[40].mxu0 }
 0x4af   : > { %v4995_v53 = vpop.f32.mrb[41].mxu0 }
 0x4b2   : > { %v2335_v9 = vpop.f32.mrb[42].mxu0 }
 0x4b3   : > { %v6747_v40 = vadd.f32 %v6744_v3, %v2335_v9  ;;  %v5019_v48 = vpop.f32.mrb[43].mxu0 }
 0x4b5   : > { %v2774_v41 = vsel %vm1336_vm3, %v6747_v40, -inf }
 0x4b6   : > { %2775 = vmax.xlane.f32.xlu1 %v2774_v41  ;;  %v2340_v20 = vpop.f32.mrb[44].mxu0 }
 0x4b7   : > { %v5022_v52 = vpop.f32.mrb[45].mxu0  ;;  %v6767_v57 = vadd.f32 %v5730_v17, %v2340_v20 }
 0x4b9   : > { %v2777_v25 = vsel %vm1336_vm3, %v6767_v57, -inf }
 0x4ba   : > { %v2345_v50 = vpop.f32.mrb[46].mxu0 }
 0x4bb   : > { %v5025_v63 = vpop.f32.mrb[47].mxu0  ;;  %v6776_v39 = vadd.f32 %v5731_v26, %v2345_v50 }
 0x4bd   : > { %v2780_v48 = vsel %vm1336_vm3, %v6776_v39, -inf }
 0x4be   : > { %v2543_v7 = vpop.f32.mrb[48].mxu0 }
 0x4bf   : > { %v5049_v6 = vpop.f32.mrb[49].mxu0  ;;  %v6786_v53 = vadd.f32 %v6744_v3, %v2543_v7 }
 0x4c1   : > { %v2792_v7 = vsel %vm1336_vm3, %v6786_v53, -inf }
 0x4c2   : > { %v2548_v8 = vpop.f32.mrb[50].mxu0 }
 0x4c3   : > { %v5052_v55 = vpop.f32.mrb[51].mxu0  ;;  %v6794_v6 = vadd.f32 %v5730_v17, %v2548_v8 }
 0x4c6   : > { %v2553_v14 = vpop.f32.mrb[52].mxu0 }
 0x4c7   : > { %v5055_v36 = vpop.f32.mrb[53].mxu0 }
 0x4cf   : > { %v6751_v30 = vpop.f32.mrb[42].mxu1 }
 0x4d0   : > { %v4974_v2 = vpop.f32.mrb[43].mxu1 }
 0x4d3   : > { %v6753_v13 = vpop.f32.mrb[44].mxu1 }
 0x4d4   : > { %v4977_v34 = vpop.f32.mrb[45].mxu1 }
 0x4d7   : > { %v6755_v22 = vpop.f32.mrb[46].mxu1 }
 0x4d8   : > { %v4980_v60 = vpop.f32.mrb[47].mxu1 }
 0x4db   : > { %v2231_v61 = vpop.f32.mrb[48].mxu1 }
 0x4dc   : > { %v6758_v5 = vadd.f32 %v6744_v3, %v2231_v61  ;;  %v5004_v19 = vpop.f32.mrb[49].mxu1  ;;  %v6802_v61 = vadd.f32 %v5731_v26, %v2553_v14 }
 0x4dd   : > { %v2795_v19 = vsel %vm1336_vm3, %v6794_v6, -inf }
 0x4de   : > { %v2765_v29 = vsel %vm1336_vm3, %v6758_v5, -inf  ;;  %v2798_v14 = vsel %vm1336_vm3, %v6802_v61, -inf }
 0x4df   : > { %2766 = vmax.xlane.f32.xlu0 %v2765_v29  ;;  %v2236_v59 = vpop.f32.mrb[50].mxu1 }
 0x4e0   : > { %v6765_v23 = vadd.f32 %v5730_v17, %v2236_v59  ;;  %v5007_v16 = vpop.f32.mrb[51].mxu1 }
 0x4e2   : > { %v2768_v56 = vsel %vm1336_vm3, %v6765_v23, -inf }
 0x4e3   : > { %2769 = vmax.xlane.f32.xlu0 %v2768_v56  ;;  %v2241_v11 = vpop.f32.mrb[52].mxu1 }
 0x4e4   : > { %v6774_v33 = vadd.f32 %v5731_v26, %v2241_v11  ;;  %v5010_v62 = vpop.f32.mrb[53].mxu1 }
 0x4e5   : > { %v2751_v10 = vpop.f32.mrb[54].mxu0 }
 0x4e6   : > { %v5079_v31 = vpop.f32.mrb[55].mxu0  ;;  %v2771_v28 = vsel %vm1336_vm3, %v6774_v33, -inf  ;;  %v6812_v56 = vadd.f32 %v6744_v3, %v2751_v10 }
 0x4e7   : > { %2778 = vmax.xlane.f32.xlu0 %v2777_v25  ;;  %2772 = vmax.xlane.f32.xlu1 %v2771_v28  ;;  %v2439_v38 = vpop.f32.mrb[54].mxu1 }
 0x4e8   : > { %v6783_v44 = vadd.f32 %v6744_v3, %v2439_v38  ;;  %v5034_v45 = vpop.f32.mrb[55].mxu1  ;;  %v2810_v38 = vsel %vm1336_vm3, %v6812_v56, -inf }
 0x4e9   : > { %v2756_v54 = vpop.f32.mrb[56].mxu0 }
 0x4ea   : > { %v5082_v9 = vpop.f32.mrb[57].mxu0  ;;  %v2783_v41 = vsel %vm1336_vm3, %v6783_v44, -inf  ;;  %v6820_v28 = vadd.f32 %v5730_v17, %v2756_v54 }
 0x4eb   : > { %2781 = vmax.xlane.f32.xlu0 %v2780_v48  ;;  %2784 = vmax.xlane.f32.xlu1 %v2783_v41  ;;  %v2444_v20 = vpop.f32.mrb[56].mxu1 }
 0x4ec   : > { %v6792_v52 = vadd.f32 %v5730_v17, %v2444_v20  ;;  %v5037_v50 = vpop.f32.mrb[57].mxu1  ;;  %v2813_v41 = vsel %vm1336_vm3, %v6820_v28, -inf  ;;  %v7264_v20 = vld [vmem:[#allocation3_spill] sm:$0xff] }
 0x4ed   : > { %v2761_v63 = vpop.f32.mrb[58].mxu0  ;;  %v7265_v50 = vld [vmem:[#allocation2_spill] sm:$0xff] }
 0x4ee   : > { %v5085_v55 = vpop.f32.mrb[59].mxu0  ;;  %v2786_v36 = vsel %vm1336_vm3, %v6792_v52, -inf  ;;  %v6828_v48 = vadd.f32 %v5731_v26, %v2761_v63 }
 0x4ef   : > { %2793 = vmax.xlane.f32.xlu0 %v2792_v7  ;;  %2787 = vmax.xlane.f32.xlu1 %v2786_v36  ;;  %v2449_v2 = vpop.f32.mrb[58].mxu1 }
 0x4f0   : > { %v6800_v34 = vadd.f32 %v5731_v26, %v2449_v2  ;;  %v5040_v60 = vpop.f32.mrb[59].mxu1  ;;  %v2816_v54 = vsel %vm1336_vm3, %v6828_v48, -inf }
 0x4f2   : > { %v2789_v8 = vsel %vm1336_vm3, %v6800_v34, -inf }
 0x4f3   : > { %2796 = vmax.xlane.f32.xlu0 %v2795_v19  ;;  %2790 = vmax.xlane.f32.xlu1 %v2789_v8  ;;  %v2647_v29 = vpop.f32.mrb[60].mxu1  ;;  %v6849_v19 = vpop.permute.xlu0 %5510 }
 0x4f4   : > { %v6809_v59 = vadd.f32 %v6744_v3, %v2647_v29  ;;  %v5064_v16 = vpop.f32.mrb[61].mxu1 }
 0x4f6   : > { %v2801_v11 = vsel %vm1336_vm3, %v6809_v59, -inf }
 0x4f7   : > { %2799 = vmax.xlane.f32.xlu0 %v2798_v14  ;;  %2802 = vmax.xlane.f32.xlu1 %v2801_v11  ;;  %v2652_v62 = vpop.f32.mrb[62].mxu1  ;;  %v6851_v8 = vpop.permute.xlu0 %3163 }
 0x4f8   : > { %v6818_v31 = vadd.f32 %v5730_v17, %v2652_v62  ;;  %v5067_v25 = vpop.f32.mrb[63].mxu1 }
 0x4fa   : > { %v2804_v3 = vsel %vm1336_vm3, %v6818_v31, -inf }
 0x4fb   : > { %2811 = vmax.xlane.f32.xlu0 %v2810_v38  ;;  %2805 = vmax.xlane.f32.xlu1 %v2804_v3  ;;  %v2657_v10 = vpop.f32.mrb[64].mxu1 }
 0x4fc   : > { %v6826_v45 = vadd.f32 %v5731_v26, %v2657_v10  ;;  %v5070_v9 = vpop.f32.mrb[65].mxu1  ;;  %v6840_v26 = vpop.permute.xlu1 %5515 }
 0x4fe   : > { %v2807_v17 = vsel %vm1336_vm3, %v6826_v45, -inf }
 0x4ff   : > { %2814 = vmax.xlane.f32.xlu0 %v2813_v41  ;;  %2808 = vmax.xlane.f32.xlu1 %v2807_v17 }
 0x500   : > { %v6842_v63 = vpop.permute.xlu1 %3261 }
 0x503   : > { %2817 = vmax.xlane.f32.xlu0 %v2816_v54 }
 0x510   : > { %5525 = vrot.lane.b32.xlu1 %v7264_v20, %s5748_s28 }
 0x519   : > { %5520 = vrot.lane.b32.xlu0 %v7265_v50, %s5748_s28 }
 0x543   : > { %v2776_v55 = vpop.xlane.xlu1 %2775 }
 0x544   : > { %v2822_v7 = vsub.f32 %v6747_v40, %v2776_v55 }
 0x546   : > { %v2843_v36 = vmul.f32 1.442695, %v2822_v7 }
 0x548   : > { %5633 = vpow2.f32 %v2843_v36 }
 0x552   : > { %v6845_v2 = vpop.eup %5633 }
 0x553   : > { %v2882_v60 = vsel %vm1336_vm3, %v6845_v2, 0.0 }
 0x554   : > { %2883 = vadd.xlane.f32.xlu0 %v2882_v60 }
 0x56c   : > { %v2767_v29 = vpop.xlane.xlu0 %2766 }
 0x56d   : > { %v2819_v16 = vsub.f32 %v6758_v5, %v2767_v29 }
 0x56f   : > { %v2837_v14 = vmul.f32 1.442695, %v2819_v16 }
 0x570   : > { %v2770_v11 = vpop.xlane.xlu0 %2769 }
 0x571   : > { %5635 = vpow2.f32 %v2837_v14  ;;  %v2820_v40 = vsub.f32 %v6765_v23, %v2770_v11 }
 0x573   : > { %v2839_v62 = vmul.f32 1.442695, %v2820_v40 }
 0x574   : > { %v2779_v25 = vpop.xlane.xlu0 %2778  ;;  %v2773_v38 = vpop.xlane.xlu1 %2772 }
 0x575   : > { %5637 = vpow2.f32 %v2839_v62  ;;  %v2823_v3 = vsub.f32 %v6767_v57, %v2779_v25  ;;  %v2821_v10 = vsub.f32 %v6774_v33, %v2773_v38 }
 0x577   : > { %v2845_v9 = vmul.f32 1.442695, %v2823_v3  ;;  %v2841_v41 = vmul.f32 1.442695, %v2821_v10 }
 0x578   : > { %v2782_v17 = vpop.xlane.xlu0 %2781  ;;  %v2785_v54 = vpop.xlane.xlu1 %2784 }
 0x579   : > { %5639 = vpow2.f32 %v2845_v9  ;;  %v2824_v5 = vsub.f32 %v6776_v39, %v2782_v17  ;;  %v2825_v20 = vsub.f32 %v6783_v44, %v2785_v54 }
 0x57a   : > { %5641 = vpow2.f32 %v2841_v41 }
 0x57b   : > { %v6859_v50 = vpop.eup %5635  ;;  %v2847_v23 = vmul.f32 1.442695, %v2824_v5  ;;  %v2849_v55 = vmul.f32 1.442695, %v2825_v20 }
 0x57c   : > { %v2794_v7 = vpop.xlane.xlu0 %2793  ;;  %v2788_v36 = vpop.xlane.xlu1 %2787  ;;  %v2873_v57 = vsel %vm1336_vm3, %v6859_v50, 0.0 }
 0x57d   : > { %5643 = vpow2.f32 %v2847_v23  ;;  %v2828_v33 = vsub.f32 %v6786_v53, %v2794_v7  ;;  %v2826_v60 = vsub.f32 %v6792_v52, %v2788_v36  ;;  %2874 = vadd.xlane.f32.xlu1 %v2873_v57 }
 0x57e   : > { %5645 = vpow2.f32 %v2849_v55 }
 0x57f   : > { %v6865_v39 = vpop.eup %5637  ;;  %v2855_v44 = vmul.f32 1.442695, %v2828_v33  ;;  %v2851_v29 = vmul.f32 1.442695, %v2826_v60 }
 0x580   : > { %v2797_v16 = vpop.xlane.xlu0 %2796  ;;  %v2791_v14 = vpop.xlane.xlu1 %2790  ;;  %v2876_v11 = vsel %vm1336_vm3, %v6865_v39, 0.0 }
 0x581   : > { %5647 = vpow2.f32 %v2855_v44  ;;  %v2829_v40 = vsub.f32 %v6794_v6, %v2797_v16  ;;  %v2827_v62 = vsub.f32 %v6800_v34, %v2791_v14  ;;  %2877 = vadd.xlane.f32.xlu1 %v2876_v11 }
 0x582   : > { %5649 = vpow2.f32 %v2851_v29 }
 0x583   : > { %v6871_v53 = vpop.eup %5639  ;;  %v2857_v52 = vmul.f32 1.442695, %v2829_v40  ;;  %v2853_v25 = vmul.f32 1.442695, %v2827_v62 }
 0x584   : > { %v6873_v38 = vpop.eup %5641  ;;  %v2800_v3 = vpop.xlane.xlu0 %2799  ;;  %v2885_v9 = vsel %vm1336_vm3, %v6871_v53, 0.0 }
 0x585   : > { %v2803_v10 = vpop.xlane.xlu1 %2802  ;;  %5651 = vpow2.f32 %v2857_v52  ;;  %v2830_v41 = vsub.f32 %v6802_v61, %v2800_v3  ;;  %2886 = vadd.xlane.f32.xlu0 %v2885_v9  ;;  %v2879_v34 = vsel %vm1336_vm3, %v6873_v38, 0.0 }
 0x586   : > { %v2831_v6 = vsub.f32 %v6809_v59, %v2803_v10  ;;  %5653 = vpow2.f32 %v2853_v25  ;;  %2880 = vadd.xlane.f32.xlu1 %v2879_v34 }
 0x587   : > { %v6881_v17 = vpop.eup %5643  ;;  %v2859_v54 = vmul.f32 1.442695, %v2830_v41 }
 0x588   : > { %v2861_v5 = vmul.f32 1.442695, %v2831_v6  ;;  %v6883_v20 = vpop.eup %5645  ;;  %v2812_v23 = vpop.xlane.xlu0 %2811  ;;  %v2888_v7 = vsel %vm1336_vm3, %v6881_v17, 0.0 }
 0x589   : > { %v2806_v55 = vpop.xlane.xlu1 %2805  ;;  %5655 = vpow2.f32 %v2859_v54  ;;  %v2834_v61 = vsub.f32 %v6812_v56, %v2812_v23  ;;  %2889 = vadd.xlane.f32.xlu0 %v2888_v7  ;;  %v2891_v36 = vsel %vm1336_vm3, %v6883_v20, 0.0 }
 0x58a   : > { %v2832_v59 = vsub.f32 %v6818_v31, %v2806_v55  ;;  %5657 = vpow2.f32 %v2861_v5  ;;  %2892 = vadd.xlane.f32.xlu1 %v2891_v36 }
 0x58b   : > { %v6891_v57 = vpop.eup %5647  ;;  %v2867_v33 = vmul.f32 1.442695, %v2834_v61 }
 0x58c   : > { %v2863_v60 = vmul.f32 1.442695, %v2832_v59  ;;  %v6893_v44 = vpop.eup %5649  ;;  %v2815_v29 = vpop.xlane.xlu0 %2814  ;;  %v2900_v14 = vsel %vm1336_vm3, %v6891_v57, 0.0 }
 0x58d   : > { %v2809_v16 = vpop.xlane.xlu1 %2808  ;;  %5659 = vpow2.f32 %v2867_v33  ;;  %v2835_v56 = vsub.f32 %v6820_v28, %v2815_v29  ;;  %2901 = vadd.xlane.f32.xlu0 %v2900_v14  ;;  %v2894_v11 = vsel %vm1336_vm3, %v6893_v44, 0.0  ;;  %v7266_v29 = vmax.f32 %v6054_v12, 0.0 }
 0x58e   : > { %v2833_v31 = vsub.f32 %v6826_v45, %v2809_v16  ;;  %5661 = vpow2.f32 %v2863_v60  ;;  %2895 = vadd.xlane.f32.xlu1 %v2894_v11  ;;  %v7267_v16 = vmax.f32 %v6034_v4, 0.0  ;;  %v5517_v11 = vunpack.i.l.bf16 %v6840_v26 }
 0x58f   : > { %v6901_v40 = vpop.eup %5651  ;;  %v2869_v62 = vmul.f32 1.442695, %v2835_v56 }
 0x590   : > { %v2865_v52 = vmul.f32 1.442695, %v2833_v31  ;;  %v6903_v25 = vpop.eup %5653  ;;  %v2818_v3 = vpop.xlane.xlu0 %2817  ;;  %v2903_v10 = vsel %vm1336_vm3, %v6901_v40, 0.0  ;;  %v5518_v31 = vunpack.i.h.bf16 %v6840_v26 }
 0x591   : > { %5663 = vpow2.f32 %v2869_v62  ;;  %v2836_v28 = vsub.f32 %v6828_v48, %v2818_v3  ;;  %2904 = vadd.xlane.f32.xlu0 %v2903_v10  ;;  %v2897_v45 = vsel %vm1336_vm3, %v6903_v25, 0.0  ;;  %v6955_v4 = vpop.permute.xlu1 %5525  ;;  %v5513_v10 = vunpack.i.h.bf16 %v6849_v19 }
 0x592   : > { %5665 = vpow2.f32 %v2865_v52  ;;  %2898 = vadd.xlane.f32.xlu1 %v2897_v45  ;;  %v5355_v3 = vpack.c.bf16 %v5518_v31, %v5517_v11 }
 0x593   : > { %v6910_v9 = vpop.eup %5655  ;;  %v2871_v41 = vmul.f32 1.442695, %v2836_v28  ;;  %v5512_v28 = vunpack.i.l.bf16 %v6849_v19 }
 0x594   : > { %v6912_v6 = vpop.eup %5657  ;;  %v2906_v34 = vsel %vm1336_vm3, %v6910_v9, 0.0  ;;  %v6944_v14 = vpop.permute.xlu0 %5520 }
 0x595   : > { %5667 = vpow2.f32 %v2871_v41  ;;  %v2909_v54 = vsel %vm1336_vm3, %v6912_v6, 0.0  ;;  %v5522_v31 = vunpack.i.l.bf16 %v6944_v14 }
 0x596   : > { %2910 = vadd.xlane.f32.xlu0 %v2909_v54  ;;  %2907 = vadd.xlane.f32.xlu1 %v2906_v34  ;;  %v5352_v54 = vpack.c.bf16 %v5513_v10, %v5512_v28 }
 0x597   : > { %v6918_v48 = vpop.eup %5659 }
 0x598   : > { %v6920_v5 = vpop.eup %5661  ;;  %v2918_v23 = vsel %vm1336_vm3, %v6918_v48, 0.0 }
 0x599   : > { %v2912_v55 = vsel %vm1336_vm3, %v6920_v5, 0.0 }
 0x59a   : > { %2913 = vadd.xlane.f32.xlu0 %v2912_v55  ;;  %2919 = vadd.xlane.f32.xlu1 %v2918_v23 }
 0x59b   : > { %v6926_v7 = vpop.eup %5663 }
 0x59c   : > { %v6928_v61 = vpop.eup %5665  ;;  %v2921_v59 = vsel %vm1336_vm3, %v6926_v7, 0.0 }
 0x59d   : > { %v2915_v36 = vsel %vm1336_vm3, %v6928_v61, 0.0 }
 0x59e   : > { %2916 = vadd.xlane.f32.xlu0 %v2915_v36  ;;  %2922 = vadd.xlane.f32.xlu1 %v2921_v59 }
 0x59f   : > { %v6934_v33 = vpop.eup %5667 }
 0x5a0   : > { %v2924_v60 = vsel %vm1336_vm3, %v6934_v33, 0.0 }
 0x5a2   : > { %2925 = vadd.xlane.f32.xlu1 %v2924_v60 }
 0x5b3   : > { %3457 = vrot.lane.b32.xlu1 %v7266_v29, %s5748_s28 }
 0x5b4   : > { %3359 = vrot.lane.b32.xlu0 %v7267_v16, %s5748_s28 }
 0x5e1   : > { %v2884_v56 = vpop.xlane.xlu0 %2883 }
 0x5e2   : > { %5669 = vrcp.f32 %v2884_v56  ;;  %v5523_v56 = vunpack.i.h.bf16 %v6944_v14  ;;  %v5527_v14 = vunpack.i.l.bf16 %v6955_v4 }
 0x5ec   : > { %v5670_v62 = vpop.eup %5669 }
 0x5ed   : > { %v2948_v52 = vmul.f32 %v5670_v62, %v6845_v2  ;;  %v5528_v62 = vunpack.i.h.bf16 %v6955_v4 }
 0x5ef   : > { %5108 = vmatmul.mubr.msk.f32.vlgmr.msra.gmra.mrb[60].mxu0 %vm1336_vm3, %v2948_v52 }
 0x5f0   : > { %5356 = vmatpush3.bf16.msra.mxu0 %v5355_v3  ;;  %5110 = vmatprep.mubr.msk.f32.mxu0 %vm5743_vm0, %v7257_v49 }
 0x5f1   : > { %5135 = vmatprep.subr.mxu0 %v7257_v49 }
 0x5f4   : > { %5136 = vmatpush3.msra.mxu0 %v6842_v63 }
 0x5f5   : > { %5360 = vmatprep.subr.bf16.mxu0 %v7258_v21 }
 0x60a   : > { %v2875_v12 = vpop.xlane.xlu1 %2874 }
 0x60b   : > { %5671 = vrcp.f32 %v2875_v12  ;;  %v5358_v12 = vpack.c.bf16 %v5523_v56, %v5522_v31 }
 0x60e   : > { %v2878_v26 = vpop.xlane.xlu1 %2877 }
 0x60f   : > { %5673 = vrcp.f32 %v2878_v26 }
 0x612   : > { %v2887_v2 = vpop.xlane.xlu0 %2886 }
 0x613   : > { %5675 = vrcp.f32 %v2887_v2  ;;  %v2881_v45 = vpop.xlane.xlu1 %2880 }
 0x614   : > { %5677 = vrcp.f32 %v2881_v45 }
 0x615   : > { %v5672_v41 = vpop.eup %5671 }
 0x616   : > { %v2945_v34 = vmul.f32 %v5672_v41, %v6859_v50  ;;  %v2890_v63 = vpop.xlane.xlu0 %2889 }
 0x617   : > { %5679 = vrcp.f32 %v2890_v63  ;;  %v2893_v23 = vpop.xlane.xlu1 %2892 }
 0x618   : > { %5681 = vrcp.f32 %v2893_v23  ;;  %5093 = vmatmul.mubr.msk.f32.vlgmr.msra.gmra.mrb[66].mxu1 %vm1336_vm3, %v2945_v34 }
 0x619   : > { %v5674_v55 = vpop.eup %5673  ;;  %5353 = vmatpush3.bf16.msra.mxu1 %v5352_v54  ;;  %5095 = vmatprep.mubr.msk.f32.mxu1 %vm5743_vm0, %v7257_v49 }
 0x61a   : > { %v2902_v59 = vpop.xlane.xlu0 %2901  ;;  %5120 = vmatprep.subr.mxu1 %v7257_v49  ;;  %v2946_v19 = vmul.f32 %v5674_v55, %v6865_v39 }
 0x61b   : > { %5683 = vrcp.f32 %v2902_v59  ;;  %v2896_v36 = vpop.xlane.xlu1 %2895 }
 0x61c   : > { %5685 = vrcp.f32 %v2896_v36  ;;  %5096 = vmatmul.mubr.msk.f32.gmra.mrb[68].mxu1 %vm1336_vm3, %v2946_v19 }
 0x61d   : > { %v5676_v50 = vpop.eup %5675  ;;  %5121 = vmatpush3.msra.mxu1 %v6851_v8  ;;  %5098 = vmatprep.mubr.msk.f32.mxu1 %vm5743_vm0, %v7257_v49 }
 0x61e   : > { %v5678_v60 = vpop.eup %5677  ;;  %v2905_v29 = vpop.xlane.xlu0 %2904  ;;  %v2949_v16 = vmul.f32 %v5676_v50, %v6871_v53  ;;  %5357 = vmatprep.subr.bf16.mxu1 %v7258_v21 }
 0x61f   : > { %5687 = vrcp.f32 %v2905_v29  ;;  %v2947_v39 = vmul.f32 %v5678_v60, %v6873_v38  ;;  %v2899_v11 = vpop.xlane.xlu1 %2898 }
 0x620   : > { %5111 = vmatmul.mubr.msk.f32.gmra.mrb[62].mxu0 %vm1336_vm3, %v2949_v16  ;;  %5689 = vrcp.f32 %v2899_v11 }
 0x621   : > { %v5680_v8 = vpop.eup %5679  ;;  %5099 = vmatmul.mubr.msk.f32.gmra.mrb[70].mxu1 %vm1336_vm3, %v2947_v39  ;;  %5113 = vmatprep.mubr.msk.f32.mxu0 %vm5743_vm0, %v7257_v49 }
 0x622   : > { %v5682_v53 = vpop.eup %5681  ;;  %5122 = vmatprep.mubr.msk.f32.mxu1 %vm5743_vm0, %v7257_v49  ;;  %v2950_v38 = vmul.f32 %v5680_v8, %v6881_v17 }
 0x623   : > { %v2951_v52 = vmul.f32 %v5682_v53, %v6883_v20  ;;  %v2911_v3 = vpop.xlane.xlu0 %2910  ;;  %v2908_v26 = vpop.xlane.xlu1 %2907  ;;  %v5361_v20 = vpack.c.bf16 %v5528_v62, %v5527_v14 }
 0x624   : > { %5691 = vrcp.f32 %v2911_v3  ;;  %5114 = vmatmul.mubr.msk.f32.gmra.mrb[64].mxu0 %vm1336_vm3, %v2950_v38 }
 0x625   : > { %v5684_v2 = vpop.eup %5683  ;;  %5693 = vrcp.f32 %v2908_v26  ;;  %5123 = vmatmul.mubr.msk.f32.vlgmr.msra.gmra.mrb[72].mxu1 %vm1336_vm3, %v2951_v52  ;;  %5137 = vmatprep.mubr.msk.f32.mxu0 %vm5743_vm0, %v7257_v49 }
 0x626   : > { %v5686_v17 = vpop.eup %5685  ;;  %v2954_v10 = vmul.f32 %v5684_v2, %v6891_v57  ;;  %5359 = vmatpush3.bf16.msra.mxu1 %v5358_v12  ;;  %5125 = vmatprep.mubr.msk.f32.mxu1 %vm5743_vm0, %v7257_v49 }
 0x627   : > { %v2914_v4 = vpop.xlane.xlu0 %2913  ;;  %v2952_v28 = vmul.f32 %v5686_v17, %v6893_v44  ;;  %5150 = vmatprep.subr.mxu1 %v7257_v49  ;;  %v2920_v45 = vpop.xlane.xlu1 %2919 }
 0x628   : > { %5695 = vrcp.f32 %v2914_v4  ;;  %5138 = vmatmul.mubr.msk.f32.vlgmr.msra.gmra.mrb[66].mxu0 %vm1336_vm3, %v2954_v10 }
 0x629   : > { %v5688_v41 = vpop.eup %5687  ;;  %5697 = vrcp.f32 %v2920_v45  ;;  %5126 = vmatmul.mubr.msk.f32.gmra.mrb[74].mxu1 %vm1336_vm3, %v2952_v28  ;;  %5362 = vmatpush3.bf16.msra.mxu0 %v5361_v20 }
 0x62a   : > { %5128 = vmatprep.mubr.msk.f32.mxu1 %vm5743_vm0, %v7257_v49  ;;  %5140 = vmatprep.mubr.msk.f32.mxu0 %vm5743_vm0, %v7257_v49  ;;  %v2955_v57 = vmul.f32 %v5688_v41, %v6901_v40  ;;  %v5690_v44 = vpop.eup %5689 }
 0x62b   : > { %v2917_v34 = vpop.xlane.xlu0 %2916  ;;  %5165 = vmatprep.subr.mxu0 %v7257_v49  ;;  %v2923_v63 = vpop.xlane.xlu1 %2922  ;;  %v2953_v54 = vmul.f32 %v5690_v44, %v6903_v25 }
 0x62c   : > { %5699 = vrcp.f32 %v2917_v34  ;;  %5141 = vmatmul.mubr.msk.f32.gmra.mrb[68].mxu0 %vm1336_vm3, %v2955_v57 }
 0x62d   : > { %5701 = vrcp.f32 %v2923_v63  ;;  %5143 = vmatprep.mubr.msk.f32.mxu0 %vm5743_vm0, %v7257_v49  ;;  %5129 = vmatmul.mubr.msk.f32.gmra.mrb[76].mxu1 %vm1336_vm3, %v2953_v54 }
 0x62e   : > { %v5692_v23 = vpop.eup %5691  ;;  %5152 = vmatprep.mubr.msk.f32.mxu1 %vm5743_vm0, %v7257_v49 }
 0x62f   : > { %v5694_v55 = vpop.eup %5693  ;;  %v2957_v40 = vmul.f32 %v5692_v23, %v6912_v6  ;;  %v3360_v59 = vpop.permute.xlu0 %3359 }
 0x630   : > { %v2926_v19 = vpop.xlane.xlu1 %2925  ;;  %5151 = vmatpush3.msra.mxu1 %v3360_v59  ;;  %v2956_v25 = vmul.f32 %v5694_v55, %v6910_v9 }
 0x631   : > { %5703 = vrcp.f32 %v2926_v19  ;;  %5363 = vmatprep.subr.bf16.mxu1 %v7258_v21  ;;  %5153 = vmatmul.mubr.msk.f32.vlgmr.msra.gmra.mrb[78].mxu1 %vm1336_vm3, %v2957_v40 }
 0x632   : > { %v5696_v36 = vpop.eup %5695  ;;  %5144 = vmatmul.mubr.msk.f32.gmra.mrb[70].mxu0 %vm1336_vm3, %v2956_v25  ;;  %5155 = vmatprep.mubr.msk.f32.mxu1 %vm5743_vm0, %v7257_v49 }
 0x633   : > { %v5698_v50 = vpop.eup %5697  ;;  %5167 = vmatprep.mubr.msk.f32.mxu0 %vm5743_vm0, %v7257_v49  ;;  %v2958_v6 = vmul.f32 %v5696_v36, %v6920_v5 }
 0x634   : > { %v2960_v60 = vmul.f32 %v5698_v50, %v6918_v48  ;;  %v3458_v9 = vpop.permute.xlu1 %3457 }
 0x635   : > { %5166 = vmatpush3.msra.mxu0 %v3458_v9  ;;  %5156 = vmatmul.mubr.msk.f32.gmra.mrb[80].mxu1 %vm1336_vm3, %v2958_v6 }
 0x636   : > { %v5700_v29 = vpop.eup %5699  ;;  %5168 = vmatmul.mubr.msk.f32.vlgmr.msra.gmra.mrb[72].mxu0 %vm1336_vm3, %v2960_v60  ;;  %5158 = vmatprep.mubr.msk.f32.mxu1 %vm5743_vm0, %v7257_v49 }
 0x637   : > { %v5702_v16 = vpop.eup %5701  ;;  %5170 = vmatprep.mubr.msk.f32.mxu0 %vm5743_vm0, %v7257_v49  ;;  %v2959_v39 = vmul.f32 %v5700_v29, %v6928_v61  ;;  %5375 = vmatprep.subr.bf16.mxu0 %v7258_v21 }
 0x638   : > { %v2961_v5 = vmul.f32 %v5702_v16, %v6926_v7 }
 0x639   : > { %5159 = vmatmul.mubr.msk.f32.gmra.mrb[82].mxu1 %vm1336_vm3, %v2959_v39  ;;  %v5750_v39 = vmov 0  }
 0x63a   : > { %5171 = vmatmul.mubr.msk.f32.gmra.mrb[74].mxu0 %vm1336_vm3, %v2961_v5  ;;  %5182 = vmatprep.mubr.msk.f32.mxu1 %vm5743_vm0, %v7257_v49  ;;  %v3642_v5 = vld [vmem:[%s7229_s7] sm:$0xff] }
 0x63b   : > { %v5704_v48 = vpop.eup %5703  ;;  %5173 = vmatprep.mubr.msk.f32.mxu0 %vm5743_vm0, %v7257_v49  ;;  %5559 = vset.pattern.permute.xlu0 %v5750_v39 }
 0x63c   : > { %v2962_v56 = vmul.f32 %v5704_v48, %v6934_v33 }
 0x63e   : > { %5174 = vmatmul.mubr.msk.f32.gmra.mrb[76].mxu0 %vm1336_vm3, %v2962_v56 }
 0x63f   : > { %5218 = vmatprep.mubr.msk.f32.mxu0 %vm5743_vm0, %v7257_v49 }
 0x6c2   : > { %v3145_v7 = vpop.f32.mrb[60].mxu0 }
 0x6c3   : > { %v5109_v61 = vpop.f32.mrb[61].mxu0 }
 0x6eb   : > { %v3047_v31 = vpop.f32.mrb[66].mxu1 }
 0x6ec   : > { %v5094_v11 = vpop.f32.mrb[67].mxu1 }
 0x6ef   : > { %v3052_v8 = vpop.f32.mrb[68].mxu1 }
 0x6f0   : > { %v5529_v53 = vpack.i.bf16 %v3052_v8, %v3047_v31  ;;  %v5097_v38 = vpop.f32.mrb[69].mxu1 }
 0x6f2   : > { %5530 = vrot.lane.b32.xlu0 %v5529_v53, %s5749_s16 }
 0x6f3   : > { %v3150_v62 = vpop.f32.mrb[62].mxu0 }
 0x6f4   : > { %v3057_v14 = vpop.f32.mrb[70].mxu1  ;;  %v5534_v52 = vpack.i.bf16 %v3150_v62, %v3145_v7  ;;  %v5112_v3 = vpop.f32.mrb[63].mxu0 }
 0x6f5   : > { %3573 = vrot.lane.b32.xlu1 %v3057_v14, %s5749_s16  ;;  %v5100_v33 = vpop.f32.mrb[71].mxu1 }
 0x6f6   : > { %5535 = vrot.lane.b32.xlu0 %v5534_v52, %s5749_s16 }
 0x6f7   : > { %v3155_v12 = vpop.f32.mrb[64].mxu0 }
 0x6f8   : > { %v3243_v26 = vpop.f32.mrb[72].mxu1  ;;  %v5115_v2 = vpop.f32.mrb[65].mxu0 }
 0x6f9   : > { %3579 = vrot.lane.b32.xlu1 %v3155_v12, %s5749_s16  ;;  %v5124_v17 = vpop.f32.mrb[73].mxu1 }
 0x6fb   : > { %v3341_v10 = vpop.f32.mrb[66].mxu0 }
 0x6fc   : > { %v3248_v20 = vpop.f32.mrb[74].mxu1  ;;  %v5139_v4 = vpop.f32.mrb[67].mxu0 }
 0x6fd   : > { %v5539_v28 = vpack.i.bf16 %v3248_v20, %v3243_v26  ;;  %v5127_v45 = vpop.f32.mrb[75].mxu1 }
 0x6ff   : > { %5540 = vrot.lane.b32.xlu0 %v5539_v28, %s5749_s16  ;;  %v3346_v41 = vpop.f32.mrb[68].mxu0 }
 0x700   : > { %v5544_v57 = vpack.i.bf16 %v3346_v41, %v3341_v10  ;;  %v5142_v44 = vpop.f32.mrb[69].mxu0  ;;  %v3253_v34 = vpop.f32.mrb[76].mxu1 }
 0x701   : > { %3585 = vrot.lane.b32.xlu1 %v3253_v34, %s5749_s16  ;;  %v5130_v63 = vpop.f32.mrb[77].mxu1 }
 0x703   : > { %5545 = vrot.lane.b32.xlu0 %v5544_v57, %s5749_s16 }
 0x704   : > { %v3439_v23 = vpop.f32.mrb[78].mxu1 }
 0x705   : > { %v3351_v54 = vpop.f32.mrb[70].mxu0  ;;  %v5154_v40 = vpop.f32.mrb[79].mxu1 }
 0x706   : > { %v5145_v55 = vpop.f32.mrb[71].mxu0 }
 0x707   : > { %3591 = vrot.lane.b32.xlu0 %v3351_v54, %s5749_s16 }
 0x708   : > { %v3444_v59 = vpop.f32.mrb[80].mxu1 }
 0x709   : > { %v3537_v19 = vpop.f32.mrb[72].mxu0  ;;  %v5549_v25 = vpack.i.bf16 %v3444_v59, %v3439_v23  ;;  %v5157_v36 = vpop.f32.mrb[81].mxu1 }
 0x70a   : > { %v5169_v50 = vpop.f32.mrb[73].mxu0 }
 0x70b   : > { %5550 = vrot.lane.b32.xlu1 %v5549_v25, %s5749_s16 }
 0x70c   : > { %v3449_v6 = vpop.f32.mrb[82].mxu1 }
 0x70d   : > { %v3542_v60 = vpop.f32.mrb[74].mxu0  ;;  %3597 = vrot.lane.b32.xlu0 %v3449_v6, %s5749_s16  ;;  %v5160_v16 = vpop.f32.mrb[83].mxu1 }
 0x70e   : > { %v5554_v9 = vpack.i.bf16 %v3542_v60, %v3537_v19  ;;  %v5172_v29 = vpop.f32.mrb[75].mxu0 }
 0x710   : > { %5555 = vrot.lane.b32.xlu1 %v5554_v9, %s5749_s16 }
 0x711   : > { %v3547_v48 = vpop.f32.mrb[76].mxu0  ;;  %3645 = vperm.xlu0 %5559, %v3642_v5  }
 0x712   : > { %v5175_v56 = vpop.f32.mrb[77].mxu0 }
 0x714   : > { %3603 = vrot.lane.b32.xlu1 %v3547_v48, %s5749_s16 }
 0x764   : > { %v5531_v7 = vpop.permute.xlu0 %5530 }
 0x765   : > { %v5533_v61 = vunpack.i.h.bf16 %v5531_v7  ;;  %v5532_v31 = vunpack.i.l.bf16 %v5531_v7 }
 0x767   : > { %v3624_v11 = vsel %vm738_vm1, %v6713_v42, %v5533_v61  ;;  %v3623_v8 = vsel %vm738_vm1, %v6711_v1, %v5532_v31  ;;  %v3574_v52 = vpop.permute.xlu1 %3573  ;;  %v7065_v42 = vld [vmem:[%s7228_s6] sm:$0xff] }
 0x768   : > { %v5364_v53 = vpack.c.bf16 %v3624_v11, %v3623_v8  ;;  %v5536_v38 = vpop.permute.xlu0 %5535  ;;  %v3625_v1 = vsel %vm738_vm1, %v6715_v35, %v3574_v52 }
 0x769   : > { %v5538_v62 = vunpack.i.h.bf16 %v5536_v38  ;;  %v5537_v14 = vunpack.i.l.bf16 %v5536_v38 }
 0x76a   : > { %5365 = vmatpush3.bf16.msra.mxu1 %v5364_v53 }
 0x76b   : > { %v3627_v3 = vsel %vm738_vm1, %v6719_v32, %v5538_v62  ;;  %v3626_v33 = vsel %vm738_vm1, %v6717_v0, %v5537_v14  ;;  %5180 = vmatprep.subr.mxu1 %v7257_v49  ;;  %v3580_v32 = vpop.permute.xlu1 %3579 }
 0x76c   : > { %v5367_v12 = vpack.c.bf16 %v3627_v3, %v3626_v33  ;;  %v3628_v17 = vsel %vm738_vm1, %v6721_v58, %v3580_v32  ;;  %v4533_v3 = vld [vmem:[%s7231_s9] ss:$0 sm:$0xff] }
 0x76e   : > { %5181 = vmatpush3.msra.mxu1 %v3625_v1 }
 0x76f   : > { %5366 = vmatprep.subr.bf16.mxu1 %v7258_v21  ;;  %5183 = vmatmul.mubr.msk.f32.vlgmr.msra.gmra.mrb[84].mxu1 %vm1336_vm3, %v7065_v42 }
 0x770   : > { %5368 = vmatpush3.bf16.msra.mxu1 %v5367_v12  ;;  %5191 = vmatprep.mubr.msk.f32.mxu1 %vm5743_vm0, %v7257_v49 }
 0x771   : > { %v5541_v0 = vpop.permute.xlu0 %5540  ;;  %5189 = vmatprep.subr.mxu1 %v7257_v49 }
 0x772   : > { %v5543_v26 = vunpack.i.h.bf16 %v5541_v0  ;;  %v5542_v2 = vunpack.i.l.bf16 %v5541_v0 }
 0x773   : > { %v3586_v58 = vpop.permute.xlu1 %3585 }
 0x774   : > { %v3630_v35 = vsel %vm738_vm1, %v6725_v18, %v5543_v26  ;;  %v3629_v10 = vsel %vm738_vm1, %v6723_v37, %v5542_v2  ;;  %5190 = vmatpush3.msra.mxu1 %v3628_v17  ;;  %v3631_v57 = vsel %vm738_vm1, %v6727_v43, %v3586_v58 }
 0x775   : > { %v5370_v20 = vpack.c.bf16 %v3630_v35, %v3629_v10  ;;  %v5546_v4 = vpop.permute.xlu0 %5545  ;;  %5192 = vmatmul.mubr.msk.f32.vlgmr.msra.gmra.mrb[86].mxu1 %vm1336_vm3, %v7065_v42  ;;  %5369 = vmatprep.subr.bf16.mxu1 %v7258_v21 }
 0x776   : > { %v5548_v28 = vunpack.i.h.bf16 %v5546_v4  ;;  %v5547_v45 = vunpack.i.l.bf16 %v5546_v4  ;;  %5200 = vmatprep.mubr.msk.f32.mxu1 %vm5743_vm0, %v7257_v49 }
 0x777   : > { %5371 = vmatpush3.bf16.msra.mxu1 %v5370_v20 }
 0x778   : > { %v3633_v18 = vsel %vm738_vm1, %v6731_v27, %v5548_v28  ;;  %v3632_v37 = vsel %vm738_vm1, %v6729_v15, %v5547_v45  ;;  %5198 = vmatprep.subr.mxu1 %v7257_v49 }
 0x779   : > { %v5373_v41 = vpack.c.bf16 %v3633_v18, %v3632_v37  ;;  %v3592_v44 = vpop.permute.xlu0 %3591 }
 0x77a   : > { %v3634_v63 = vsel %vm738_vm1, %v6733_v47, %v3592_v44  ;;  %v4071_v47 = vld [vmem:[%s7230_s8] sm:$0xff] }
 0x77b   : > { %5199 = vmatpush3.msra.mxu1 %v3631_v57 }
 0x77c   : > { %5372 = vmatprep.subr.bf16.mxu1 %v7258_v21  ;;  %5201 = vmatmul.mubr.msk.f32.vlgmr.msra.gmra.mrb[88].mxu1 %vm1336_vm3, %v7065_v42 }
 0x77d   : > { %5374 = vmatpush3.bf16.msra.mxu1 %v5373_v41  ;;  %5209 = vmatprep.mubr.msk.f32.mxu1 %vm5743_vm0, %v7257_v49  ;;  %v5551_v27 = vpop.permute.xlu1 %5550 }
 0x77e   : > { %5207 = vmatprep.subr.mxu1 %v7257_v49  ;;  %v5553_v15 = vunpack.i.h.bf16 %v5551_v27  ;;  %v5552_v34 = vunpack.i.l.bf16 %v5551_v27 }
 0x780   : > { %v3636_v43 = vsel %vm738_vm1, %v6753_v13, %v5553_v15  ;;  %v3635_v54 = vsel %vm738_vm1, %v6751_v30, %v5552_v34  ;;  %v4072_v30 = vld [vmem:[%s7230_s8 + $0x8] sm:$0xff]  ;;  %v3598_v13 = vpop.permute.xlu0 %3597 }
 0x781   : > { %5208 = vmatpush3.msra.mxu1 %v3634_v63  ;;  %v5376_v23 = vpack.c.bf16 %v3636_v43, %v3635_v54  ;;  %v5381_v36 = vpack.c.bf16 %v4072_v30, %v4071_v47  ;;  %v3637_v50 = vsel %vm738_vm1, %v6755_v22, %v3598_v13 }
 0x782   : > { %v5556_v55 = vpop.permute.xlu1 %5555  ;;  %5210 = vmatmul.mubr.msk.f32.vlgmr.msra.gmra.mrb[90].mxu1 %vm1336_vm3, %v7065_v42  ;;  %5378 = vmatprep.subr.bf16.mxu1 %v7258_v21 }
 0x783   : > { %v5558_v40 = vunpack.i.h.bf16 %v5556_v55  ;;  %v5557_v59 = vunpack.i.l.bf16 %v5556_v55  ;;  %5227 = vmatprep.mubr.msk.f32.mxu1 %vm5743_vm0, %v7257_v49  ;;  %5377 = vmatpush3.bf16.msra.mxu0 %v5376_v23 }
 0x784   : > { %5216 = vmatprep.subr.mxu0 %v7257_v49 }
 0x785   : > { %v3639_v19 = vsel %vm738_vm1, %v6737_v51, %v5558_v40  ;;  %v3638_v21 = vsel %vm738_vm1, %v6735_v46, %v5557_v59  ;;  %v4073_v46 = vld [vmem:[%s7230_s8 + $0x10] sm:$0xff] }
 0x786   : > { %v5379_v25 = vpack.c.bf16 %v3639_v19, %v3638_v21  ;;  %v3604_v6 = vpop.permute.xlu1 %3603 }
 0x787   : > { %5217 = vmatpush3.msra.mxu0 %v3637_v50  ;;  %v3640_v51 = vsel %vm738_vm1, %v6739_v24, %v3604_v6 }
 0x788   : > { %5380 = vmatpush3.bf16.msra.mxu1 %v5379_v25  ;;  %5219 = vmatmul.mubr.msk.f32.vlgmr.msra.gmra.mrb[78].mxu0 %vm1336_vm3, %v7065_v42 }
 0x789   : > { %5225 = vmatprep.subr.mxu1 %v7257_v49  ;;  %5382 = vmatprep.subr.bf16.mxu0 %v5381_v36  ;;  %v4074_v49 = vld [vmem:[%s7230_s8 + $0x18] sm:$0xff] }
 0x78a   : > { %5384 = vmatpush3.bf16.msra.mxu0 %v5381_v36  ;;  %v5385_v22 = vpack.c.bf16 %v4074_v49, %v4073_v46 }
 0x78c   : > { %5226 = vmatpush3.msra.mxu1 %v3640_v51  ;;  %5386 = vmatprep.subr.bf16.mxu0 %v5385_v22 }
 0x78d   : > { %5228 = vmatmul.mubr.msk.f32.vlgmr.msra.gmra.mrb[92].mxu1 %vm1336_vm3, %v7065_v42 }
 0x78e   : > { %5388 = vmatpush3.bf16.msra.mxu0 %v5385_v22 }
 0x790   : > { %v3646_v60 = vpop.permute.xlu0 %3645 }
 0x842   : > { %v3717_v9 = vpop.f32.mrb[84].mxu1 }
 0x843   : > { %v5184_v24 = vpop.f32.mrb[85].mxu1  ;;  %v3718_v29 = vadd.f32 %v3717_v9, %v3646_v60 }
 0x845   : > { %5238 = vmatprep.mubr.msk.f32.mxu0 %vm4082_vm4, %v3718_v29 }
 0x848   : > { %v3787_v16 = vpop.f32.mrb[86].mxu1 }
 0x849   : > { %v3788_v39 = vadd.f32 %v3787_v16, %v3646_v60  ;;  %v5193_v5 = vpop.f32.mrb[87].mxu1 }
 0x84b   : > { %5239 = vmatmul.mubr.msk.f32.vlgmr.msra.gmra.mrb[80].mxu0 %vm4082_vm4, %v3788_v39 }
 0x84f   : > { %v3857_v48 = vpop.f32.mrb[88].mxu1 }
 0x850   : > { %v3858_v56 = vadd.f32 %v3857_v48, %v3646_v60  ;;  %v5202_v7 = vpop.f32.mrb[89].mxu1 }
 0x852   : > { %5241 = vmatprep.mubr.msk.f32.mxu0 %vm4082_vm4, %v3858_v56 }
 0x855   : > { %v3927_v61 = vpop.f32.mrb[90].mxu1 }
 0x856   : > { %v3928_v31 = vadd.f32 %v3927_v61, %v3646_v60  ;;  %v5211_v11 = vpop.f32.mrb[91].mxu1 }
 0x858   : > { %5242 = vmatmul.mubr.msk.f32.gmra.mrb[82].mxu0 %vm4082_vm4, %v3928_v31 }
 0x85b   : > { %v3997_v8 = vpop.f32.mrb[78].mxu0 }
 0x85c   : > { %v3998_v53 = vadd.f32 %v3997_v8, %v3646_v60  ;;  %v5220_v38 = vpop.f32.mrb[79].mxu0 }
 0x85e   : > { %5244 = vmatprep.mubr.msk.f32.mxu0 %vm4082_vm4, %v3998_v53 }
 0x860   : > { %v4067_v62 = vpop.f32.mrb[92].mxu1 }
 0x861   : > { %v4068_v14 = vadd.f32 %v4067_v62, %v3646_v60  ;;  %v5229_v52 = vpop.f32.mrb[93].mxu1 }
 0x863   : > { %5245 = vmatmul.mubr.msk.f32.gmra.mrb[84].mxu0 %vm4082_vm4, %v4068_v14 }
 0x91e   : > { %v5240_v33 = vpop.f32.mrb[80].mxu0 }
 0x91f   : > { %v4173_v12 = vadd.f32 %v5240_v33, %v4533_v3  ;;  %v4167_v42 = vpop.f32.mrb[81].mxu0 }
 0x920   : > { %v4168_v1 = vadd.f32 %v4533_v3, %v4167_v42 }
 0x921   : > { %v4197_v32 = vmax.f32 %v4173_v12, 0.0 }
 0x922   : > { %v4196_v0 = vmax.f32 %v4168_v1, 0.0 }
 0x923   : > { %v4205_v26 = vsel %vm4082_vm4, %v4197_v32, 0.0 }
 0x924   : > { %4206 = vadd.xlane.f32.xlu0 %v4205_v26  ;;  %v4202_v2 = vsel %vm4082_vm4, %v4196_v0, 0.0 }
 0x925   : > { %4203 = vadd.xlane.f32.xlu1 %v4202_v2 }
 0x92b   : > { %v5243_v17 = vpop.f32.mrb[82].mxu0 }
 0x92c   : > { %v4183_v35 = vadd.f32 %v5243_v17, %v4533_v3  ;;  %v4177_v10 = vpop.f32.mrb[83].mxu0 }
 0x92d   : > { %v4178_v20 = vadd.f32 %v4533_v3, %v4177_v10  ;;  %v7184_v10 = vld [vmem:[%s7232_s10] ss:$0 sm:$0xff] }
 0x92e   : > { %v4199_v4 = vmax.f32 %v4183_v35, 0.0 }
 0x92f   : > { %v4198_v28 = vmax.f32 %v4178_v20, 0.0 }
 0x930   : > { %v4211_v45 = vsel %vm4082_vm4, %v4199_v4, 0.0 }
 0x931   : > { %4212 = vadd.xlane.f32.xlu0 %v4211_v45  ;;  %v4208_v58 = vsel %vm4082_vm4, %v4198_v28, 0.0 }
 0x932   : > { %4209 = vadd.xlane.f32.xlu1 %v4208_v58 }
 0x936   : > { %v5246_v18 = vpop.f32.mrb[84].mxu0 }
 0x937   : > { %v4193_v37 = vadd.f32 %v5246_v18, %v4533_v3  ;;  %v4187_v41 = vpop.f32.mrb[85].mxu0 }
 0x938   : > { %v4188_v57 = vadd.f32 %v4533_v3, %v4187_v41 }
 0x939   : > { %v4201_v44 = vmax.f32 %v4193_v37, 0.0 }
 0x93a   : > { %v4200_v27 = vmax.f32 %v4188_v57, 0.0 }
 0x93b   : > { %v4217_v15 = vsel %vm4082_vm4, %v4201_v44, 0.0 }
 0x93c   : > { %4218 = vadd.xlane.f32.xlu0 %v4217_v15  ;;  %v4214_v34 = vsel %vm4082_vm4, %v4200_v27, 0.0 }
 0x93d   : > { %4215 = vadd.xlane.f32.xlu1 %v4214_v34 }
 0x9b1   : > { %v4207_v63 = vpop.xlane.xlu0 %4206 }
 0x9b2   : > { %v4222_v43 = vmul.f32 0.03125, %v4207_v63  ;;  %v4204_v54 = vpop.xlane.xlu1 %4203 }
 0x9b3   : > { %v4221_v23 = vmul.f32 0.03125, %v4204_v54 }
 0x9b4   : > { %v7151_v55 = vsub.f32 %v4197_v32, %v4222_v43  ;;  %v4541_v43 = vld [vmem:[%s7233_s11] ss:$0 sm:$0xff] }
 0x9b5   : > { %v7153_v40 = vsub.f32 %v4196_v0, %v4221_v23 }
 0x9b6   : > { %v4234_v59 = vmul.f32 %v7151_v55, %v7151_v55  ;;  %v4325_v37 = vmul.f32 %v7184_v10, %v7151_v55 }
 0x9b7   : > { %v4233_v47 = vmul.f32 %v7153_v40, %v7153_v40  ;;  %v4324_v63 = vmul.f32 %v7184_v10, %v7153_v40 }
 0x9b8   : > { %v4242_v30 = vsel %vm4082_vm4, %v4234_v59, 0.0 }
 0x9b9   : > { %4243 = vadd.xlane.f32.xlu0 %v4242_v30  ;;  %v4239_v13 = vsel %vm4082_vm4, %v4233_v47, 0.0 }
 0x9ba   : > { %4240 = vadd.xlane.f32.xlu1 %v4239_v13 }
 0x9be   : > { %v4213_v19 = vpop.xlane.xlu0 %4212 }
 0x9bf   : > { %v4224_v21 = vmul.f32 0.03125, %v4213_v19  ;;  %v4210_v25 = vpop.xlane.xlu1 %4209 }
 0x9c0   : > { %v4223_v36 = vmul.f32 0.03125, %v4210_v25 }
 0x9c1   : > { %v7161_v50 = vsub.f32 %v4199_v4, %v4224_v21 }
 0x9c2   : > { %v7163_v6 = vsub.f32 %v4198_v28, %v4223_v36 }
 0x9c3   : > { %v4236_v51 = vmul.f32 %v7161_v50, %v7161_v50 }
 0x9c4   : > { %v4235_v46 = vmul.f32 %v7163_v6, %v7163_v6 }
 0x9c5   : > { %v4248_v49 = vsel %vm4082_vm4, %v4236_v51, 0.0 }
 0x9c6   : > { %4249 = vadd.xlane.f32.xlu0 %v4248_v49  ;;  %v4245_v22 = vsel %vm4082_vm4, %v4235_v46, 0.0 }
 0x9c7   : > { %4246 = vadd.xlane.f32.xlu1 %v4245_v22 }
 0x9c9   : > { %v4219_v60 = vpop.xlane.xlu0 %4218 }
 0x9ca   : > { %v4226_v9 = vmul.f32 0.03125, %v4219_v60  ;;  %v4216_v24 = vpop.xlane.xlu1 %4215 }
 0x9cb   : > { %v4225_v29 = vmul.f32 0.03125, %v4216_v24 }
 0x9cc   : > { %v7171_v16 = vsub.f32 %v4201_v44, %v4226_v9 }
 0x9cd   : > { %v7173_v39 = vsub.f32 %v4200_v27, %v4225_v29  ;;  %v4327_v29 = vmul.f32 %v7184_v10, %v7161_v50 }
 0x9ce   : > { %v4238_v5 = vmul.f32 %v7171_v16, %v7171_v16  ;;  %v4329_v50 = vmul.f32 %v7184_v10, %v7171_v16 }
 0x9cf   : > { %v4237_v48 = vmul.f32 %v7173_v39, %v7173_v39 }
 0x9d0   : > { %v4254_v56 = vsel %vm4082_vm4, %v4238_v5, 0.0 }
 0x9d1   : > { %4255 = vadd.xlane.f32.xlu0 %v4254_v56  ;;  %v4251_v7 = vsel %vm4082_vm4, %v4237_v48, 0.0 }
 0x9d2   : > { %4252 = vadd.xlane.f32.xlu1 %v4251_v7  ;;  %v4326_v7 = vmul.f32 %v7184_v10, %v7163_v6  ;;  %v4328_v6 = vmul.f32 %v7184_v10, %v7173_v39 }
 0xa46   : > { %v4244_v61 = vpop.xlane.xlu0 %4243 }
 0xa47   : > { %v4258_v31 = vmul.f32 0.032258064, %v4244_v61  ;;  %v4241_v11 = vpop.xlane.xlu1 %4240 }
 0xa48   : > { %v4257_v8 = vmul.f32 0.032258064, %v4241_v11 }
 0xa49   : > { %5705 = vrsqrt.f32 %v4258_v31  ;;  %vm4272_vm5 = vcmp.eq.f32.partialorder %v4258_v31, inf  ;;  %vm4274_vm6 = vcmp.eq.f32.partialorder %v4258_v31, 0.0  ;;  %v4275_v33 = vand.u32 2147483648, %v4258_v31 }
 0xa4a   : > { %5707 = vrsqrt.f32 %v4257_v8  ;;  %vm4265_vm7 = vcmp.eq.f32.partialorder %v4257_v8, inf  ;;  %v4268_v32 = vand.u32 2147483648, %v4257_v8  ;;  %vm4267_vm8 = vcmp.eq.f32.partialorder %v4257_v8, 0.0 }
 0xa53   : > { %v5706_v53 = vpop.eup %5705  ;;  %v4250_v38 = vpop.xlane.xlu0 %4249 }
 0xa54   : > { %v5708_v62 = vpop.eup %5707  ;;  %v4271_v14 = vmul.f32 %v5706_v53, %v4258_v31  ;;  %v4260_v52 = vmul.f32 0.032258064, %v4250_v38  ;;  %v4247_v3 = vpop.xlane.xlu1 %4246 }
 0xa55   : > { %v4264_v12 = vmul.f32 %v5708_v62, %v4257_v8  ;;  %v4259_v42 = vmul.f32 0.032258064, %v4247_v3 }
 0xa56   : > { %v4273_v1 = vsel %vm4272_vm5, %v4258_v31, %v4271_v14  ;;  %5709 = vrsqrt.f32 %v4260_v52  ;;  %vm4286_vm9 = vcmp.eq.f32.partialorder %v4260_v52, inf  ;;  %v4289_v57 = vand.u32 2147483648, %v4260_v52 }
 0xa57   : > { %v4276_v0 = vsel %vm4274_vm6, %v4275_v33, %v4273_v1  ;;  %v4266_v26 = vsel %vm4265_vm7, %v4257_v8, %v4264_v12  ;;  %5711 = vrsqrt.f32 %v4259_v42  ;;  %vm4288_vm10 = vcmp.eq.f32.partialorder %v4260_v52, 0.0 }
 0xa58   : > { %v4306_v2 = vadd.f32 1e-06, %v4276_v0  ;;  %v4269_v17 = vsel %vm4267_vm8, %v4268_v32, %v4266_v26  ;;  %vm4279_vm11 = vcmp.eq.f32.partialorder %v4259_v42, inf  ;;  %v4282_v15 = vand.u32 2147483648, %v4259_v42 }
 0xa59   : > { %v4305_v35 = vadd.f32 1e-06, %v4269_v17  ;;  %vm4281_vm12 = vcmp.eq.f32.partialorder %v4259_v42, 0.0 }
 0xa5a   : > { %5713 = vrcp.f32 %v4306_v2 }
 0xa5b   : > { %5715 = vrcp.f32 %v4305_v35 }
 0xa5e   : > { %v4256_v20 = vpop.xlane.xlu0 %4255 }
 0xa5f   : > { %v4262_v4 = vmul.f32 0.032258064, %v4256_v20  ;;  %v4253_v28 = vpop.xlane.xlu1 %4252 }
 0xa60   : > { %v5710_v45 = vpop.eup %5709  ;;  %v4261_v58 = vmul.f32 0.032258064, %v4253_v28 }
 0xa61   : > { %v5712_v18 = vpop.eup %5711  ;;  %v4285_v41 = vmul.f32 %v5710_v45, %v4260_v52  ;;  %5717 = vrsqrt.f32 %v4262_v4  ;;  %vm4300_vm13 = vcmp.eq.f32.partialorder %v4262_v4, inf  ;;  %v4303_v46 = vand.u32 2147483648, %v4262_v4 }
 0xa62   : > { %v4278_v44 = vmul.f32 %v5712_v18, %v4259_v42  ;;  %5719 = vrsqrt.f32 %v4261_v58  ;;  %vm4302_vm14 = vcmp.eq.f32.partialorder %v4262_v4, 0.0  ;;  %vm4293_vm15 = vcmp.eq.f32.partialorder %v4261_v58, inf }
 0xa63   : > { %v4287_v27 = vsel %vm4286_vm9, %v4260_v52, %v4285_v41  ;;  %v4296_v60 = vand.u32 2147483648, %v4261_v58  ;;  %vm4295_vm0 = vcmp.eq.f32.partialorder %v4261_v58, 0.0 }
 0xa64   : > { %v5714_v34 = vpop.eup %5713  ;;  %v4290_v54 = vsel %vm4288_vm10, %v4289_v57, %v4287_v27  ;;  %v4280_v23 = vsel %vm4279_vm11, %v4259_v42, %v4278_v44 }
 0xa65   : > { %v5716_v55 = vpop.eup %5715  ;;  %v4331_v59 = vmul.f32 %v5714_v34, %v4325_v37  ;;  %v4308_v47 = vadd.f32 1e-06, %v4290_v54  ;;  %v4283_v30 = vsel %vm4281_vm12, %v4282_v15, %v4280_v23 }
 0xa66   : > { %v4330_v13 = vmul.f32 %v5716_v55, %v4324_v63  ;;  %v4307_v40 = vadd.f32 1e-06, %v4283_v30 }
 0xa67   : > { %v4344_v19 = vadd.f32 %v4541_v43, %v4331_v59  ;;  %5721 = vrcp.f32 %v4308_v47 }
 0xa68   : > { %v4343_v21 = vadd.f32 %v4541_v43, %v4330_v13  ;;  %5723 = vrcp.f32 %v4307_v40 }
 0xa69   : > { %4350 = vst.msk [vmem:[%s7197_s23 + $0x8] sm:$0xff] %vm4082_vm4, %v4344_v19 }
 0xa6a   : > { %4349 = vst.msk [vmem:[%s7197_s23] sm:$0xff] %vm4082_vm4, %v4343_v21 }
 0xa6b   : > { %v5718_v25 = vpop.eup %5717 }
 0xa6c   : > { %v5720_v36 = vpop.eup %5719  ;;  %v4299_v51 = vmul.f32 %v5718_v25, %v4262_v4 }
 0xa6d   : > { %v4292_v49 = vmul.f32 %v5720_v36, %v4261_v58 }
 0xa6e   : > { %v4301_v22 = vsel %vm4300_vm13, %v4262_v4, %v4299_v51 }
 0xa6f   : > { %v4304_v9 = vsel %vm4302_vm14, %v4303_v46, %v4301_v22  ;;  %v4294_v24 = vsel %vm4293_vm15, %v4261_v58, %v4292_v49 }
 0xa70   : > { %v4310_v5 = vadd.f32 1e-06, %v4304_v9  ;;  %v4297_v48 = vsel %vm4295_vm0, %v4296_v60, %v4294_v24 }
 0xa71   : > { %v5722_v56 = vpop.eup %5721  ;;  %v4309_v61 = vadd.f32 1e-06, %v4297_v48 }
 0xa72   : > { %v5724_v31 = vpop.eup %5723  ;;  %v4333_v11 = vmul.f32 %v5722_v56, %v4327_v29  ;;  %5725 = vrcp.f32 %v4310_v5 }
 0xa73   : > { %v4332_v8 = vmul.f32 %v5724_v31, %v4326_v7  ;;  %5727 = vrcp.f32 %v4309_v61 }
 0xa74   : > { %v4346_v53 = vadd.f32 %v4541_v43, %v4333_v11 }
 0xa75   : > { %v4345_v38 = vadd.f32 %v4541_v43, %v4332_v8 }
 0xa76   : > { %4352 = vst.msk [vmem:[%s7197_s23 + $0x18] sm:$0xff] %vm4082_vm4, %v4346_v53 }
 0xa77   : > { %4351 = vst.msk [vmem:[%s7197_s23 + $0x10] sm:$0xff] %vm4082_vm4, %v4345_v38 }
 0xa7c   : > { %v5726_v62 = vpop.eup %5725 }
 0xa7d   : > { %v5728_v14 = vpop.eup %5727  ;;  %v4335_v52 = vmul.f32 %v5726_v62, %v4329_v50 }
 0xa7e   : > { %v4334_v3 = vmul.f32 %v5728_v14, %v4328_v6 }
 0xa7f   : > { %v4348_v33 = vadd.f32 %v4541_v43, %v4335_v52 }
 0xa80   : > { %v4347_v12 = vadd.f32 %v4541_v43, %v4334_v3 }
 0xa81   : > { %4354 = vst.msk [vmem:[%s7197_s23 + $0x28] sm:$0xff] %vm4082_vm4, %v4348_v33 }
 0xa82   : > { %4353 = vst.msk [vmem:[%s7197_s23 + $0x20] sm:$0xff] %vm4082_vm4, %v4347_v12 }
 0xa83 PF: > { %s22_s21 = sadd.s32 1, %s5738_s21  }
 0xa84   : > { %p19_p4 = scmp.ge.s32.totalorder %s22_s21, 4  }
 0xa86   :  { %21 = sbr.rel (!%p19_p4) target bundleno = 1 (0x1), region = 98 }

</bundles_post_ra>
